<compile_context>
chip_gen: v6e
topology: v6e:2x2x1
jax: 0.10.0
libtpu: 0.0.40
codegen_flags: <defaults>
</compile_context>

<pallas_src>
import numpy as np
import jax
import jax.numpy as jnp
from jax.experimental import pallas as pl
from jax.experimental.pallas import tpu as pltpu


# ----------------------------- host-side helpers -----------------------------

def avgpool_matrix(out_size: int, in_size: int) -> np.ndarray:
    """A (out_size, in_size) matrix s.t. A @ v averages non-overlapping blocks."""
    s = in_size // out_size
    A = np.zeros((out_size, in_size), dtype=np.float32)
    for p in range(out_size):
        A[p, p * s:(p + 1) * s] = 1.0 / s
    return A


def bilinear_matrix(out_size: int, in_size: int) -> np.ndarray:
    """PyTorch bilinear (align_corners=False) interpolation as a matrix."""
    U = np.zeros((out_size, in_size), dtype=np.float32)
    if in_size == 1:
        U[:, 0] = 1.0
        return U
    scale = in_size / out_size
    for d in range(out_size):
        src = (d + 0.5) * scale - 0.5
        src = max(src, 0.0)
        i0 = min(int(np.floor(src)), in_size - 1)
        i1 = min(i0 + 1, in_size - 1)
        lam = min(max(src - i0, 0.0), 1.0)
        U[d, i0] += 1.0 - lam
        U[d, i1] += lam
    return U


def build_operators(H, W, pooled_sizes, conv_w, bn_scale, bn_bias, pcol=128):
    """Pack pool / (conv1x1 + folded BN) / upsample for all branches into
    dense lane-aligned operators (all numpy, host side)."""
    HW = H * W
    n_br, M, C = conv_w.shape
    total_cols = sum(p * p for p in pooled_sizes)
    assert total_cols <= pcol, (total_cols, pcol)

    ka_all = np.zeros((HW, pcol), np.float32)       # x_f @ ka_all -> pooled (C, pcol)
    ku_all = np.zeros((pcol, HW), np.float32)       # act @ ku_all -> up (4M, HW)
    mask = np.zeros((n_br * M, pcol), np.float32)   # keep branches/padding independent
    w_stack = np.zeros((n_br * M, C), np.float32)   # BN scale folded into conv weight
    bias = np.zeros((n_br * M, 1), np.float32)      # folded BN bias

    off = 0
    for k, P in enumerate(pooled_sizes):
        A = avgpool_matrix(P, H)                    # (P, H)
        U = bilinear_matrix(H, P)                   # (H, P)
        # pooled[c, p*P+q] = sum_{h,w} A[p,h] A[q,w] x[c, h*W+w]
        ka_all[:, off:off + P * P] = np.kron(A, A).T
        # up[m, h*W+w]    = sum_{p,q} U[h,p] U[w,q] act[m, p*P+q]
        ku_all[off:off + P * P, :] = np.kron(U, U).T
        mask[k * M:(k + 1) * M, off:off + P * P] = 1.0
        w_stack[k * M:(k + 1) * M, :] = bn_scale[k][:, None] * conv_w[k]
        bias[k * M:(k + 1) * M, 0] = bn_bias[k]
        off += P * P

    return (jnp.asarray(ka_all), jnp.asarray(w_stack), jnp.asarray(bias),
            jnp.asarray(mask), jnp.asarray(ku_all))


# --------------------------------- kernel ------------------------------------

def pyramid_kernel(x_ref, ka_ref, w_ref, b_ref, mask_ref, ku_ref, out_ref):
    # x_ref:   (Nb*C, HW)   lane-dense channels of Nb images
    # out_ref: (Nb*4M, HW)  pyramid branches only (8-sublane aligned slab)
    x = x_ref[...]
    ka = ka_ref[...]
    ku = ku_ref[...]
    w = w_ref[...]                       # (4M, C) conv weight with BN scale folded in
    bvec = b_ref[...]                    # (4M, 1)  folded BN bias
    maskv = mask_ref[...]                # (4M, PCOL) branch / padding mask

    M4, C = w.shape
    Nb = x.shape[0] // C

    # (1) avg-pool: all 4 branches x Nb images in ONE MXU matmul (K = HW = 1024)
    pooled = jnp.dot(x, ka, preferred_element_type=jnp.float32)      # (Nb*C, PCOL)

    # (2) 1x1 conv (+ folded BN scale): K = C is tiny, keep it OFF the MXU —
    #     unrolled broadcast-FMAs on the VPU over the 128-lane pooled rows.
    # (3) folded BN bias + ReLU, then mask other branches' / padding columns.
    act_blocks = []
    for b in range(Nb):                                              # static unroll
        zb = w[:, 0:1] * pooled[b * C:b * C + 1, :]                  # (4M, PCOL)
        for c in range(1, C):
            zb = zb + w[:, c:c + 1] * pooled[b * C + c:b * C + c + 1, :]
        act_blocks.append(jnp.maximum(zb + bvec, 0.0) * maskv)       # (4M, PCOL)
    act = act_blocks[0] if Nb == 1 else jnp.concatenate(act_blocks, axis=0)

    # (4) bilinear upsample: all branches x images in ONE lane-dense MXU matmul,
    #     written as a single aligned (Nb*4M, 1024) store.
    out_ref[...] = jnp.dot(act, ku, preferred_element_type=jnp.float32)


# --------------------------------- wrapper -----------------------------------

def pyramid_module(x, ka_all, w_stack, bias, mask, ku_all):
    N, C, H, W = x.shape
    HW = H * W
    M4 = w_stack.shape[0]
    PCOL = ka_all.shape[1]

    # Batch Nb images per grid step (fills MXU rows, amortizes per-step
    # overhead) while keeping 2 "parallel" steps when possible so both v7x
    # TensorCores get work; v5e/v6e simply see a 1- or 2-step grid.
    G = 2 if (N >= 2 and N % 2 == 0) else 1
    Nb = N // G

    x_flat = x.reshape(N * C, HW)        # lane-dense (rows = image-major channels)

    flops = 2 * N * (C * HW * PCOL + M4 * C * PCOL + M4 * PCOL * HW)
    bytes_accessed = 4 * (N * C * HW                    # input
                          + HW * PCOL + PCOL * HW       # ka_all, ku_all
                          + M4 * C + M4 + M4 * PCOL     # w_stack, bias, mask
                          + N * M4 * HW)                # output

    def const_spec(a):
        nd = a.ndim
        return pl.BlockSpec(a.shape, lambda n, _nd=nd: (0,) * _nd)

    fn = pl.pallas_call(
        pyramid_kernel,
        out_shape=jax.ShapeDtypeStruct((N * M4, HW), jnp.float32),
        grid=(G,),
        in_specs=[
            pl.BlockSpec((Nb * C, HW), lambda n: (n, 0)),   # Nb images / step
            const_spec(ka_all),                             # (1024, 128)
            const_spec(w_stack),                            # (4M, C)
            const_spec(bias),                               # (4M, 1)
            const_spec(mask),                               # (4M, 128)
            const_spec(ku_all),                             # (128, 1024)
        ],
        out_specs=pl.BlockSpec((Nb * M4, HW), lambda n: (n, 0)),
        compiler_params=pltpu.CompilerParams(
            dimension_semantics=("parallel",)),
        cost_estimate=pl.CostEstimate(flops=flops, transcendentals=0,
                                      bytes_accessed=bytes_accessed),
    )
    pyr = fn(x_flat, ka_all, w_stack, bias, mask, ku_all)   # (N*4M, HW)
    pyr = pyr.reshape(N, M4, H, W)
    # Passthrough concat lives in the wrapper so the kernel's bulk store stays
    # 8-sublane aligned (no masked vst starting at row C=4).
    return jnp.concatenate([x, pyr], axis=1)


# ------------------------------ pure-JAX reference ----------------------------

def reference(x, conv_w, bn_scale, bn_bias, pooled_sizes):
    N, C, H, W = x.shape
    outs = [x]
    for k, P in enumerate(pooled_sizes):
        s = H // P
        pooled = x.reshape(N, C, P, s, P, s).mean(axis=(3, 5))             # (N,C,P,P)
        z = jnp.einsum('mc,ncpq->nmpq', conv_w[k], pooled)
        act = jnp.maximum(z * bn_scale[k][None, :, None, None]
                          + bn_bias[k][None, :, None, None], 0.0)
        U = jnp.asarray(bilinear_matrix(H, P))
        up = jnp.einsum('hp,nmpq->nmhq', U, act)
        up = jnp.einsum('nmhq,wq->nmhw', up, U)
        outs.append(up)
    return jnp.concatenate(outs, axis=1)


# ----------------------------------- main ------------------------------------

if __name__ == "__main__":
    # Spatial = scales[0] = 32 (pool_1 reduces to 1x1, upsample target 32x32).
    # N = 4 so each of the 2 parallel grid steps batches Nb = 2 images.
    N, C_in, M_mid, H, W = 4, 4, 4, 32, 32
    scales = [32, 16, 8, 4]
    pooled_sizes = [H // s for s in scales]                  # [1, 2, 4, 8]

    key = jax.random.PRNGKey(0)
    k_x, k_w, k_g, k_b, k_m, k_v = jax.random.split(key, 6)

    x = jax.random.normal(k_x, (N, C_in, H, W), dtype=jnp.float32)

    # 1x1 conv weights (no bias), one per branch: (4, M, C)
    conv_w = 0.1 * jax.random.normal(k_w, (4, M_mid, C_in), dtype=jnp.float32)

    # Deterministic BatchNorm (inference) parameters, folded into scale/bias.
    eps = 1e-5
    gamma = 0.5 + jax.random.uniform(k_g, (4, M_mid), dtype=jnp.float32)
    beta = 0.1 * jax.random.normal(k_b, (4, M_mid), dtype=jnp.float32)
    r_mean = 0.1 * jax.random.normal(k_m, (4, M_mid), dtype=jnp.float32)
    r_var = 0.5 + jax.random.uniform(k_v, (4, M_mid), dtype=jnp.float32)
    bn_scale = gamma / jnp.sqrt(r_var + eps)                 # (4, M)
    bn_bias = beta - r_mean * bn_scale                       # (4, M)

    # Packed operators (host-side numpy construction).
    ops = build_operators(H, W, pooled_sizes,
                          np.asarray(conv_w), np.asarray(bn_scale),
                          np.asarray(bn_bias))

    out = pyramid_module(x, *ops)
    out = jax.block_until_ready(out)

    assert out.shape == (N, C_in + 4 * M_mid, H, W), out.shape
    assert bool(jnp.all(jnp.isfinite(out)))
    # passthrough channels must equal the input exactly
    assert bool(jnp.allclose(out[:, :C_in], x))
    # full numerical check against a pure-JAX reference of the module semantics
    ref = reference(x, conv_w, bn_scale, bn_bias, pooled_sizes)
    max_err = float(jnp.max(jnp.abs(out - ref)))
    assert bool(jnp.allclose(out, ref, atol=1e-4, rtol=1e-4)), max_err

    print("KERNEL_OK")
</pallas_src>

<mosaic_0001>
module attributes {stable_mosaic.version = 11 : i64} {
  func.func @pyramid_kernel(%arg0: i32, %arg1: memref<8x1024xf32, #tpu.memory_space<vmem>>, %arg2: memref<1024x128xf32, #tpu.memory_space<vmem>>, %arg3: memref<16x4xf32, #tpu.memory_space<vmem>>, %arg4: memref<16x1xf32, #tpu.memory_space<vmem>>, %arg5: memref<16x128xf32, #tpu.memory_space<vmem>>, %arg6: memref<128x1024xf32, #tpu.memory_space<vmem>>, %arg7: memref<32x1024xf32, #tpu.memory_space<vmem>>) attributes {dimension_semantics = [#tpu.dimension_semantics<parallel>], iteration_bounds = array<i64: 2>, scalar_prefetch = 0 : i64, scratch_operands = 0 : i64, tpu.core_type = #tpu.core_type<tc>, window_params = [{transform_indices = @transform_0, window_bounds = array<i64: 8, 1024>}, {pipeline_mode = #tpu.pipeline_mode<synchronous>, transform_indices = @transform_1, window_bounds = array<i64: 1024, 128>}, {pipeline_mode = #tpu.pipeline_mode<synchronous>, transform_indices = @transform_2, window_bounds = array<i64: 16, 4>}, {pipeline_mode = #tpu.pipeline_mode<synchronous>, transform_indices = @transform_3, window_bounds = array<i64: 16, 1>}, {pipeline_mode = #tpu.pipeline_mode<synchronous>, transform_indices = @transform_4, window_bounds = array<i64: 16, 128>}, {pipeline_mode = #tpu.pipeline_mode<synchronous>, transform_indices = @transform_5, window_bounds = array<i64: 128, 1024>}, {transform_indices = @transform_6, window_bounds = array<i64: 32, 1024>}]} {
    %c0 = arith.constant 0 : index
    %c0_0 = arith.constant 0 : index
    %0 = vector.load %arg1[%c0, %c0_0] : memref<8x1024xf32, #tpu.memory_space<vmem>>, vector<8x1024xf32>
    %c0_1 = arith.constant 0 : index
    %c0_2 = arith.constant 0 : index
    %1 = vector.load %arg2[%c0_1, %c0_2] : memref<1024x128xf32, #tpu.memory_space<vmem>>, vector<1024x128xf32>
    %c0_3 = arith.constant 0 : index
    %c0_4 = arith.constant 0 : index
    %2 = vector.load %arg6[%c0_3, %c0_4] : memref<128x1024xf32, #tpu.memory_space<vmem>>, vector<128x1024xf32>
    %c0_5 = arith.constant 0 : index
    %c0_6 = arith.constant 0 : index
    %3 = vector.load %arg3[%c0_5, %c0_6] : memref<16x4xf32, #tpu.memory_space<vmem>>, vector<16x4xf32>
    %c0_7 = arith.constant 0 : index
    %c0_8 = arith.constant 0 : index
    %4 = vector.load %arg4[%c0_7, %c0_8] : memref<16x1xf32, #tpu.memory_space<vmem>>, vector<16x1xf32>
    %c0_9 = arith.constant 0 : index
    %c0_10 = arith.constant 0 : index
    %5 = vector.load %arg5[%c0_9, %c0_10] : memref<16x128xf32, #tpu.memory_space<vmem>>, vector<16x128xf32>
    %cst = arith.constant dense<0.000000e+00> : vector<8x128xf32>
    %6 = tpu.matmul %0, %1, %cst {dimension_numbers = #tpu.dot_dimension_numbers<[1], [0], [0], [1], [0, 0, 1, 1], [], []>} : vector<8x1024xf32>, vector<1024x128xf32>, vector<8x128xf32> -> vector<8x128xf32>
    %7 = vector.extract_strided_slice %3 {offsets = [0, 0], sizes = [16, 1], strides = [1, 1]} : vector<16x4xf32> to vector<16x1xf32>
    %8 = vector.extract_strided_slice %6 {offsets = [0, 0], sizes = [1, 128], strides = [1, 1]} : vector<8x128xf32> to vector<1x128xf32>
    %9 = vector.broadcast %7 : vector<16x1xf32> to vector<16x128xf32>
    %10 = vector.broadcast %8 : vector<1x128xf32> to vector<16x128xf32>
    %11 = arith.mulf %9, %10 : vector<16x128xf32>
    %12 = vector.extract_strided_slice %3 {offsets = [0, 1], sizes = [16, 1], strides = [1, 1]} : vector<16x4xf32> to vector<16x1xf32>
    %13 = vector.extract_strided_slice %6 {offsets = [1, 0], sizes = [1, 128], strides = [1, 1]} : vector<8x128xf32> to vector<1x128xf32>
    %14 = vector.broadcast %12 : vector<16x1xf32> to vector<16x128xf32>
    %15 = vector.broadcast %13 : vector<1x128xf32> to vector<16x128xf32>
    %16 = arith.mulf %14, %15 : vector<16x128xf32>
    %17 = arith.addf %11, %16 : vector<16x128xf32>
    %18 = vector.extract_strided_slice %3 {offsets = [0, 2], sizes = [16, 1], strides = [1, 1]} : vector<16x4xf32> to vector<16x1xf32>
    %19 = vector.extract_strided_slice %6 {offsets = [2, 0], sizes = [1, 128], strides = [1, 1]} : vector<8x128xf32> to vector<1x128xf32>
    %20 = vector.broadcast %18 : vector<16x1xf32> to vector<16x128xf32>
    %21 = vector.broadcast %19 : vector<1x128xf32> to vector<16x128xf32>
    %22 = arith.mulf %20, %21 : vector<16x128xf32>
    %23 = arith.addf %17, %22 : vector<16x128xf32>
    %24 = vector.extract_strided_slice %3 {offsets = [0, 3], sizes = [16, 1], strides = [1, 1]} : vector<16x4xf32> to vector<16x1xf32>
    %25 = vector.extract_strided_slice %6 {offsets = [3, 0], sizes = [1, 128], strides = [1, 1]} : vector<8x128xf32> to vector<1x128xf32>
    %26 = vector.broadcast %24 : vector<16x1xf32> to vector<16x128xf32>
    %27 = vector.broadcast %25 : vector<1x128xf32> to vector<16x128xf32>
    %28 = arith.mulf %26, %27 : vector<16x128xf32>
    %29 = arith.addf %23, %28 : vector<16x128xf32>
    %30 = vector.broadcast %4 : vector<16x1xf32> to vector<16x128xf32>
    %31 = arith.addf %29, %30 : vector<16x128xf32>
    %cst_11 = arith.constant 0.000000e+00 : f32
    %32 = vector.broadcast %cst_11 : f32 to vector<16x128xf32>
    %33 = arith.maximumf %31, %32 : vector<16x128xf32>
    %34 = arith.mulf %33, %5 : vector<16x128xf32>
    %35 = vector.extract_strided_slice %3 {offsets = [0, 0], sizes = [16, 1], strides = [1, 1]} : vector<16x4xf32> to vector<16x1xf32>
    %36 = vector.extract_strided_slice %6 {offsets = [4, 0], sizes = [1, 128], strides = [1, 1]} : vector<8x128xf32> to vector<1x128xf32>
    %37 = vector.broadcast %35 : vector<16x1xf32> to vector<16x128xf32>
    %38 = vector.broadcast %36 : vector<1x128xf32> to vector<16x128xf32>
    %39 = arith.mulf %37, %38 : vector<16x128xf32>
    %40 = vector.extract_strided_slice %3 {offsets = [0, 1], sizes = [16, 1], strides = [1, 1]} : vector<16x4xf32> to vector<16x1xf32>
    %41 = vector.extract_strided_slice %6 {offsets = [5, 0], sizes = [1, 128], strides = [1, 1]} : vector<8x128xf32> to vector<1x128xf32>
    %42 = vector.broadcast %40 : vector<16x1xf32> to vector<16x128xf32>
    %43 = vector.broadcast %41 : vector<1x128xf32> to vector<16x128xf32>
    %44 = arith.mulf %42, %43 : vector<16x128xf32>
    %45 = arith.addf %39, %44 : vector<16x128xf32>
    %46 = vector.extract_strided_slice %3 {offsets = [0, 2], sizes = [16, 1], strides = [1, 1]} : vector<16x4xf32> to vector<16x1xf32>
    %47 = vector.extract_strided_slice %6 {offsets = [6, 0], sizes = [1, 128], strides = [1, 1]} : vector<8x128xf32> to vector<1x128xf32>
    %48 = vector.broadcast %46 : vector<16x1xf32> to vector<16x128xf32>
    %49 = vector.broadcast %47 : vector<1x128xf32> to vector<16x128xf32>
    %50 = arith.mulf %48, %49 : vector<16x128xf32>
    %51 = arith.addf %45, %50 : vector<16x128xf32>
    %52 = vector.extract_strided_slice %3 {offsets = [0, 3], sizes = [16, 1], strides = [1, 1]} : vector<16x4xf32> to vector<16x1xf32>
    %53 = vector.extract_strided_slice %6 {offsets = [7, 0], sizes = [1, 128], strides = [1, 1]} : vector<8x128xf32> to vector<1x128xf32>
    %54 = vector.broadcast %52 : vector<16x1xf32> to vector<16x128xf32>
    %55 = vector.broadcast %53 : vector<1x128xf32> to vector<16x128xf32>
    %56 = arith.mulf %54, %55 : vector<16x128xf32>
    %57 = arith.addf %51, %56 : vector<16x128xf32>
    %58 = vector.broadcast %4 : vector<16x1xf32> to vector<16x128xf32>
    %59 = arith.addf %57, %58 : vector<16x128xf32>
    %cst_12 = arith.constant 0.000000e+00 : f32
    %60 = vector.broadcast %cst_12 : f32 to vector<16x128xf32>
    %61 = arith.maximumf %59, %60 : vector<16x128xf32>
    %62 = arith.mulf %61, %5 : vector<16x128xf32>
    %63 = tpu.concatenate %34, %62 in 0 : vector<16x128xf32>, vector<16x128xf32> -> vector<32x128xf32>
    %cst_13 = arith.constant dense<0.000000e+00> : vector<32x1024xf32>
    %64 = tpu.matmul %63, %2, %cst_13 {dimension_numbers = #tpu.dot_dimension_numbers<[1], [0], [0], [1], [0, 0, 1, 1], [], []>} : vector<32x128xf32>, vector<128x1024xf32>, vector<32x1024xf32> -> vector<32x1024xf32>
    %c0_14 = arith.constant 0 : index
    %c0_15 = arith.constant 0 : index
    %65 = vector.load %arg7[%c0_14, %c0_15] : memref<32x1024xf32, #tpu.memory_space<vmem>>, vector<32x1024xf32>
    tpu.vector_store %arg7[%c0_14, %c0_15], %64 {strides = array<i32>} : memref<32x1024xf32, #tpu.memory_space<vmem>>, vector<32x1024xf32>,
    return
  }
  func.func @transform_0(%arg0: i32) -> (i32, i32) {
    %c0_i32 = arith.constant 0 : i32
    %c0_i32_0 = arith.constant 0 : i32
    return %arg0, %c0_i32 : i32, i32
  }
  func.func @transform_1(%arg0: i32) -> (i32, i32) {
    %c0_i32 = arith.constant 0 : i32
    %c0_i32_0 = arith.constant 0 : i32
    %c0_i32_1 = arith.constant 0 : i32
    return %c0_i32, %c0_i32_0 : i32, i32
  }
  func.func @transform_2(%arg0: i32) -> (i32, i32) {
    %c0_i32 = arith.constant 0 : i32
    %c0_i32_0 = arith.constant 0 : i32
    %c0_i32_1 = arith.constant 0 : i32
    return %c0_i32, %c0_i32_0 : i32, i32
  }
  func.func @transform_3(%arg0: i32) -> (i32, i32) {
    %c0_i32 = arith.constant 0 : i32
    %c0_i32_0 = arith.constant 0 : i32
    %c0_i32_1 = arith.constant 0 : i32
    return %c0_i32, %c0_i32_0 : i32, i32
  }
  func.func @transform_4(%arg0: i32) -> (i32, i32) {
    %c0_i32 = arith.constant 0 : i32
    %c0_i32_0 = arith.constant 0 : i32
    %c0_i32_1 = arith.constant 0 : i32
    return %c0_i32, %c0_i32_0 : i32, i32
  }
  func.func @transform_5(%arg0: i32) -> (i32, i32) {
    %c0_i32 = arith.constant 0 : i32
    %c0_i32_0 = arith.constant 0 : i32
    %c0_i32_1 = arith.constant 0 : i32
    return %c0_i32, %c0_i32_0 : i32, i32
  }
  func.func @transform_6(%arg0: i32) -> (i32, i32) {
    %c0_i32 = arith.constant 0 : i32
    %c0_i32_0 = arith.constant 0 : i32
    return %arg0, %c0_i32 : i32, i32
  }
}

</mosaic_0001>

<bundles_post_ra>
// kernel: tpu_custom_call.1
= control target key start
LH: loop header
LB: loop body
LE: loop exit
PB: predicated region body
PF: predicated region fallthrough
CT: control target
= control target key end

     0   :  { %s2208_s0 = inlined_call_operand.hbm [shape: f32[16,1024], index: 0, kind: input, shape index: {}]   ;;  %s2209_s1 = inlined_call_operand.hbm [shape: f32[1024,128], index: 1, kind: input, shape index: {}]   ;;  %s2210_s2 = inlined_call_operand.vmem [shape: f32[16,4], index: 2, kind: input, shape index: {}]   ;;  %s2211_s3 = inlined_call_operand.vmem [shape: f32[16,1], index: 3, kind: input, shape index: {}]   ;;  %s2212_s4 = inlined_call_operand.vmem [shape: f32[16,128], index: 4, kind: input, shape index: {}]   ;;  %s2213_s5 = inlined_call_operand.hbm [shape: f32[128,1024], index: 5, kind: input, shape index: {}]   ;;  %s2214_s6 = inlined_call_operand.hbm [shape: f32[64,1024], index: 6, kind: output, shape index: {}]  }
   0x1   :  { %2219 = sst [smem:[#allocation12_spill]] %s2209_s1 }
   0x2   :  { %11 = vsyncpa [#allocation3], 0 }
   0x3   :  { %13 = vsyncpa [#allocation3 + $0x1], 0 }
   0x4   :  { %14 = vsyncpa [#allocation6], 0 }
   0x5   :  { %15 = vsyncpa [#allocation4], 0 }
   0x6   :  { %17 = vsyncpa [#allocation4 + $0x1], 0  ;;  %s1910_s21 = smov 0   ;;  %s1912_s22 = smov 0  }
   0x7   :  { %s1914_s23 = smov 0   ;;  %s1916_s24 = smov 0  }
   0x8 LB: > { %s1931_s25 = sadd.s32 4294967295, %s1858_s24   ;;  %s1459_s26 = sadd.s32 4294967294, %s1858_s24   ;;  %s1858_s24 = sphi %s1916_s24, %s2238_s24   ;;  %s1854_s23 = sphi %s1914_s23, %s2237_s23   ;;  %s1850_s22 = sphi %s1912_s22, %s2236_s22   ;;  %s1846_s21 = sphi %s1910_s21, %s2235_s21  }
   0x9   : > { %p43_p0 = scmp.ne.s32.totalorder %s1850_s22, %s1846_s21  ;;  %p2215_p1 = scmp.eq.s32.totalorder %s1931_s25, 0 }
   0xa   : > { %p178_p3 = scmp.eq.s32.totalorder %s1459_s26, 1  ;;  %p1460_p5 = scmp.ge.s32.totalorder %s1858_s24, 1 }
   0xb   : > { %p1940_p4 = por %p2215_p1, %p43_p0  ;;  %p185_p7 = scmp.lt.s32.totalorder %s1858_s24, 3 }
   0xc   : > { %p1945_p6 = por %p178_p3, %p43_p0  ;;  %s1860_s30 = smov [#allocation5]  }
   0xd   : > { %s2220_s27 = scalar_select %p1940_p4, 1, 0 }
   0xe   : > { %s2221_s28 = scalar_select %p1945_p6, 1, 0 }
   0xf   : > { %p1950_p8 = pnand %p1460_p5, %p185_p7  ;;  %s197_s7 = sshll.u32 %s1860_s30, 4  ;;  %s198_s7 = int_to_ptr.vmem [resolvable:$true] %s197_s7 }
  0x10   : > { %s1861_s9 = smov [#allocation7]   ;;  %s1721_s11 = scalar_lea.vmem %s198_s7, 16384 }
  0x11   : > { %s2222_s29 = scalar_select %p1950_p8, 1, 0 }
  0x12   : > { %p1633_p9 = pneg %p1950_p8  ;;  %s219_s10 = sshll.u32 %s1861_s9, 4  ;;  %s220_s10 = int_to_ptr.vmem [resolvable:$true] %s219_s10 }
  0x13   : > { %p1722_p13 = scmp.ne.s32.totalorder %s198_s7, %s1721_s11  ;;  %p1729_p5 = scmp.lt.s32.totalorder %s198_s7, %s198_s7 }
  0x14   : > { %p1959_p11 = pnand %p1633_p9, %p2215_p1  ;;  %p1730_p7 = scmp.lt.s32.totalorder %s1721_s11, %s1721_s11 }
  0x16   : > { %p1712_p12 = pneg %p1959_p11  ;;  %p1731_p10 = por %p1730_p7, %p1729_p5 }
  0x18   : > { %p1724_p0 = pnand %p1722_p13, %p1712_p12 }
  0x1a   : > { %p1725_p3 = pneg %p1724_p0 }
  0x1c   : > { %p1732_p9 = pnand %p1731_p10, %p1725_p3 }
  0x1e   : > { %1735 = shalt.err (!%p1732_p9)
}
  0x1f   : > { %s1862_s12 = smov 128   ;;  %s1863_s13 = smov 8  }
  0x20   : > { %s2224_s1 = sld [smem:[#allocation12_spill]]  ;;  %s1747_s16 = scalar_lea.vmem %s220_s10, 16384 }
  0x21   : > { %p1748_p1 = scmp.ne.s32.totalorder %s220_s10, %s1747_s16  ;;  %p1755_p2 = scmp.lt.s32.totalorder %s220_s10, %s220_s10 }
  0x22   : > { %p1756_p6 = scmp.lt.s32.totalorder %s1747_s16, %s1747_s16 }
  0x23   : > { %p1750_p13 = pnand %p1748_p1, %p1712_p12 }
  0x24   : > { %p1757_p5 = por %p1756_p6, %p1755_p2 }
  0x25   : > { %p1751_p0 = pneg %p1750_p13 }
  0x26   : > { %1636 = dma.hbm_to_vmem [thread:$0]  (!%p1959_p11), %s2224_s1, 16384, %s198_s7, [#allocation6], %s1862_s12, %s1862_s12, %s1863_s13  }
  0x27   : > { %p1758_p10 = pnand %p1757_p5, %p1751_p0 }
  0x29   : > { %1761 = shalt.err (!%p1758_p10)
}
  0x2a   : > { %s1864_s17 = smov 1024   ;;  %s1865_s18 = smov 64  }
  0x2b   : > { %1639 = dma.hbm_to_vmem [thread:$0]  (!%p1959_p11), %s2213_s5, 16384, %s220_s10, [#allocation6], %s1864_s17, %s1864_s17, %s1865_s18  }
  0x2c   : > { %s1982_s26 = sadd.s32 1, %s1858_s24   ;;  %s30_s7 = sadd.s32 1, %s1854_s23 }
  0x2d   : > { %s27_s30 = ssub.s32 %s1858_s24, %s1982_s26  ;;  %p37_p2 = scmp.ne.s32.totalorder %s1854_s23, %s1850_s22 }
  0x2e   : > { %p28_p1 = scmp.eq.s32.totalorder %s27_s30, 0  ;;  %p38_p6 = scmp.eq.s32.totalorder %s1858_s24, 0 }
  0x2f   : > { %p2225_p3 = scmp.eq.s32.totalorder %s1931_s25, 1  ;;  %p1650_p9 = scmp.lt.s32.totalorder %s1858_s24, 2 }
  0x30   : > { %s1991_s9 = scalar_select %p28_p1, %s1854_s23, %s30_s7  }
  0x31   : > { %p39_p12 = por %p38_p6, %p37_p2  ;;  %p1995_p7 = por %p2225_p3, %p37_p2 }
  0x32   : > { %s233_s8 = sand.u32 1, %s1854_s23   ;;  %s1478_s10 = sshll.u32 %s1858_s24, 10 }
  0x33   : > { %s2226_s11 = scalar_select %p1995_p7, 1, 0 }
  0x34   : > { %s1464_s12 = sshll.u32 %s233_s8, 6  ;;  %s2005_s15 = scalar_lea.hbm %s2208_s0, %s1478_s10 }
  0x35   : > { %s237_s16 = scalar_lea.vmem [#allocation2], %s1464_s12  ;;  %p2007_p11 = pnand %p1650_p9, %p39_p12 }
  0x36   : > { %s245_s17 = sshll.u32 %s237_s16, 4  ;;  %s234_s19 = scalar_lea.sflag [#allocation3], %s233_s8  ;;  %s246_s17 = int_to_ptr.vmem [resolvable:$true] %s245_s17 }
  0x37   : > { %s1762_s20 = scalar_lea.hbm %s2005_s15, 1024  ;;  %p1764_p0 = pneg %p2007_p11 }
  0x38   : > { %p1763_p13 = scmp.ne.s32.totalorder %s2005_s15, %s1762_s20  ;;  %s1767_s10 = scalar_lea.hbm %s2208_s0, 2048 }
  0x39   : > { %p1768_p1 = scmp.lt.s32.totalorder %s2005_s15, %s2208_s0  ;;  %p1769_p2 = scmp.lt.s32.totalorder %s1767_s10, %s1762_s20 }
  0x3a   : > { %p1765_p5 = pnand %p1764_p0, %p1763_p13 }
  0x3b   : > { %p1770_p6 = por %p1769_p2, %p1768_p1 }
  0x3c   : > { %p1766_p10 = pneg %p1765_p5 }
  0x3e   : > { %p1771_p12 = pnand %p1770_p6, %p1766_p10 }
  0x40   : > { %1774 = shalt.err (!%p1771_p12)
}
  0x41   : > { %s1775_s14 = scalar_lea.vmem %s246_s17, 1024  ;;  %s1866_s8 = smov [#allocation2]  }
  0x42   : > { %p1776_p3 = scmp.ne.s32.totalorder %s246_s17, %s1775_s14  ;;  %s1780_s16 = sshll.u32 %s1866_s8, 4  ;;  %s1781_s16 = int_to_ptr.vmem [resolvable:$false] %s1780_s16 }
  0x43   : > { %s1782_s1 = scalar_lea.vmem %s1781_s16, 2048  ;;  %p1783_p13 = scmp.lt.s32.totalorder %s246_s17, %s1781_s16 }
  0x44   : > { %p1778_p9 = pnand %p1776_p3, %p1764_p0  ;;  %p1784_p5 = scmp.lt.s32.totalorder %s1782_s1, %s1775_s14 }
  0x46   : > { %p1779_p7 = pneg %p1778_p9  ;;  %p1785_p4 = por %p1784_p5, %p1783_p13 }
  0x48   : > { %p1786_p8 = pnand %p1785_p4, %p1779_p7 }
  0x4a   : > { %1789 = shalt.err (!%p1786_p8)
}
  0x4b   : > { %1643 = dma.hbm_to_vmem [thread:$0]  (!%p2007_p11), %s2005_s15, 1024, %s246_s17, %s234_s19  }
  0x4c   : > { %p2228_p10 = scmp.ne.s32.totalorder %s2222_s29, 0 }
  0x4d   : > { %s2028_s20 = sand.u32 (!%p2228_p10), 1, %s1850_s22   ;;  %p2229_p0 = scmp.ne.s32.totalorder (!%p2228_p10), %s2220_s27, 0 }
  0x4e   : > { %254 = sbr.rel (%p2228_p10) target bundleno = 633 (0x279), region = 44  ;;  %s1468_s30 = sshll.u32 (!%p2228_p10), %s2028_s20, 6 }
  0x4f   : > { %s257_s7 = scalar_lea.sflag (!%p2228_p10), [#allocation3], %s2028_s20  ;;  %s2032_s10 = scalar_lea.vmem (!%p2228_p10), [#allocation2], %s1468_s30 }
  0x53   : > { %1833 = dma.done.wait (%p2229_p0), %s257_s7, 1024  }
  0x54   : > { %1835 = vsyncadd (%p2229_p0), %s257_s7, 4294966272  ;;  %p2230_p4 = scmp.eq.s32.totalorder %s1931_s25, 0 }
  0x56   : > { %1837 = dma.done.wait (%p2230_p4), [#allocation6], 32768   ;;  %p2231_p8 = pmov %p2230_p4 }
  0x57   : > { %v1867_v0 = vmov 2   ;;  %v1868_v1 = vmov 0   ;;  %v337_v2 = vld [vmem:[#allocation5 + $0xf8] sm:$0xff]  ;;  %v336_v6 = vld [vmem:[#allocation5 + $0xf0] sm:$0xff]  ;;  %v335_v10 = vld [vmem:[#allocation5 + $0xe8] sm:$0xff]  ;;  %s1471_s30 = sshll.u32 %s2028_s20, 8 }
  0x58   : > { %1839 = vsyncadd (%p2231_p8), [#allocation6], 4294934528  ;;  %1701 = vset.pattern.permute.xlu1 %v1867_v0  ;;  %1699 = vset.pattern.permute.xlu0 %v1868_v1  ;;  %v369_v3 = vld [vmem:[#allocation5 + $0x1f8] sm:$0xff]  ;;  %v368_v7 = vld [vmem:[#allocation5 + $0x1f0] sm:$0xff]  ;;  %s2124_s7 = scalar_lea.vmem [#allocation8], %s1471_s30  ;;  %p2232_p11 = scmp.ne.s32.totalorder %s2226_s11, 0 }
  0x59   : > { %v321_v4 = vld [vmem:[#allocation5 + $0x78] sm:$0xff]  ;;  %1481 = vmatprep.subr.mxu0 %v337_v2  ;;  %1516 = vmatprep.subr.mxu1 %v369_v3  ;;  %v320_v8 = vld [vmem:[#allocation5 + $0x70] sm:$0xff]  ;;  %v367_v11 = vld [vmem:[#allocation5 + $0x1e8] sm:$0xff]  ;;  %s1367_s1 = sshll.u32 %s2124_s7, 4  ;;  %s1872_s18 = smov [#allocation8]   ;;  %s2161_s1 = int_to_ptr.vmem [resolvable:$true] %s1367_s1 }
  0x5a   : > { %v353_v5 = vld [vmem:[#allocation5 + $0x178] sm:$0xff]  ;;  %1482 = vmatpush3.msra.mxu0 %v321_v4  ;;  %v352_v9 = vld [vmem:[#allocation5 + $0x170] sm:$0xff]  ;;  %v319_v12 = vld [vmem:[#allocation5 + $0x68] sm:$0xff]  ;;  %s1790_s17 = scalar_lea.vmem %s2161_s1, 4096  ;;  %s1794_s19 = sshll.u32 %s1872_s18, 4  ;;  %s1795_s19 = int_to_ptr.vmem [resolvable:$false] %s1794_s19 }
  0x5b   : > { %1517 = vmatpush3.msra.mxu1 %v353_v5  ;;  %1483 = vmatprep.subr.mxu0 %v336_v6  ;;  %v351_v13 = vld [vmem:[#allocation5 + $0x168] sm:$0xff]  ;;  %v334_v14 = vld [vmem:[#allocation5 + $0xe0] sm:$0xff]  ;;  %v333_v18 = vld [vmem:[#allocation5 + $0xd8] sm:$0xff]  ;;  %p1791_p7 = scmp.ne.s32.totalorder %s2161_s1, %s1790_s17  ;;  %s1796_s13 = scalar_lea.vmem %s1795_s19, 8192 }
  0x5c   : > { %1518 = vmatprep.subr.mxu1 %v368_v7  ;;  %1484 = vmatpush3.msra.mxu0 %v320_v8  ;;  %v366_v15 = vld [vmem:[#allocation5 + $0x1e0] sm:$0xff]  ;;  %v365_v19 = vld [vmem:[#allocation5 + $0x1d8] sm:$0xff]  ;;  %v332_v22 = vld [vmem:[#allocation5 + $0xd0] sm:$0xff]  ;;  %p1797_p6 = scmp.lt.s32.totalorder %s2161_s1, %s1795_s19  ;;  %p1798_p12 = scmp.lt.s32.totalorder %s1796_s13, %s1790_s17 }
  0x5d   : > { %1519 = vmatpush3.msra.mxu1 %v352_v9  ;;  %1485 = vmatprep.subr.mxu0 %v335_v10  ;;  %v318_v16 = vld [vmem:[#allocation5 + $0x60] sm:$0xff]  ;;  %v317_v20 = vld [vmem:[#allocation5 + $0x58] sm:$0xff]  ;;  %v364_v23 = vld [vmem:[#allocation5 + $0x1d0] sm:$0xff]  ;;  %p1792_p1 = pnand %p1791_p7, %p2232_p11 }
  0x5e   : > { %1520 = vmatprep.subr.mxu1 %v367_v11  ;;  %v350_v17 = vld [vmem:[#allocation5 + $0x160] sm:$0xff]  ;;  %1486 = vmatpush3.msra.mxu0 %v319_v12  ;;  %v349_v21 = vld [vmem:[#allocation5 + $0x158] sm:$0xff]  ;;  %v316_v24 = vld [vmem:[#allocation5 + $0x50] sm:$0xff]  ;;  %p1799_p3 = por %p1798_p12, %p1797_p6 }
  0x5f   : > { %1521 = vmatpush3.msra.mxu1 %v351_v13  ;;  %1487 = vmatprep.subr.mxu0 %v334_v14  ;;  %v348_v25 = vld [vmem:[#allocation5 + $0x150] sm:$0xff]  ;;  %v331_v26 = vld [vmem:[#allocation5 + $0xc8] sm:$0xff]  ;;  %v330_v30 = vld [vmem:[#allocation5 + $0xc0] sm:$0xff]  ;;  %p1793_p2 = pneg %p1792_p1 }
  0x60   : > { %1522 = vmatprep.subr.mxu1 %v366_v15  ;;  %1488 = vmatpush3.msra.mxu0 %v318_v16  ;;  %v363_v27 = vld [vmem:[#allocation5 + $0x1c8] sm:$0xff]  ;;  %v362_v31 = vld [vmem:[#allocation5 + $0x1c0] sm:$0xff]  ;;  %v329_v34 = vld [vmem:[#allocation5 + $0xb8] sm:$0xff] }
  0x61   : > { %1523 = vmatpush3.msra.mxu1 %v350_v17  ;;  %1489 = vmatprep.subr.mxu0 %v333_v18  ;;  %v315_v28 = vld [vmem:[#allocation5 + $0x48] sm:$0xff]  ;;  %v314_v32 = vld [vmem:[#allocation5 + $0x40] sm:$0xff]  ;;  %v361_v35 = vld [vmem:[#allocation5 + $0x1b8] sm:$0xff]  ;;  %p1800_p9 = pnand %p1799_p3, %p1793_p2 }
  0x62   : > { %1524 = vmatprep.subr.mxu1 %v365_v19  ;;  %1490 = vmatpush3.msra.mxu0 %v317_v20  ;;  %v347_v29 = vld [vmem:[#allocation5 + $0x148] sm:$0xff]  ;;  %v346_v33 = vld [vmem:[#allocation5 + $0x140] sm:$0xff]  ;;  %v313_v36 = vld [vmem:[#allocation5 + $0x38] sm:$0xff] }
  0x63   : > { %1525 = vmatpush3.msra.mxu1 %v349_v21  ;;  %1491 = vmatprep.subr.mxu0 %v332_v22  ;;  %v345_v37 = vld [vmem:[#allocation5 + $0x138] sm:$0xff]  ;;  %v328_v38 = vld [vmem:[#allocation5 + $0xb0] sm:$0xff]  ;;  %v327_v42 = vld [vmem:[#allocation5 + $0xa8] sm:$0xff] }
  0x64   : > { %1526 = vmatprep.subr.mxu1 %v364_v23  ;;  %1492 = vmatpush3.msra.mxu0 %v316_v24  ;;  %v360_v39 = vld [vmem:[#allocation5 + $0x1b0] sm:$0xff]  ;;  %v359_v43 = vld [vmem:[#allocation5 + $0x1a8] sm:$0xff]  ;;  %v326_v46 = vld [vmem:[#allocation5 + $0xa0] sm:$0xff] }
  0x65   : > { %1527 = vmatpush3.msra.mxu1 %v348_v25  ;;  %1493 = vmatprep.subr.mxu0 %v331_v26  ;;  %v312_v40 = vld [vmem:[#allocation5 + $0x30] sm:$0xff]  ;;  %v311_v44 = vld [vmem:[#allocation5 + $0x28] sm:$0xff]  ;;  %v358_v47 = vld [vmem:[#allocation5 + $0x1a0] sm:$0xff] }
  0x66   : > { %1528 = vmatprep.subr.mxu1 %v363_v27  ;;  %1494 = vmatpush3.msra.mxu0 %v315_v28  ;;  %v344_v41 = vld [vmem:[#allocation5 + $0x130] sm:$0xff]  ;;  %v343_v45 = vld [vmem:[#allocation5 + $0x128] sm:$0xff]  ;;  %v310_v48 = vld [vmem:[#allocation5 + $0x20] sm:$0xff] }
  0x67   : > { %1529 = vmatpush3.msra.mxu1 %v347_v29  ;;  %1495 = vmatprep.subr.mxu0 %v330_v30  ;;  %v342_v49 = vld [vmem:[#allocation5 + $0x120] sm:$0xff]  ;;  %v325_v50 = vld [vmem:[#allocation5 + $0x98] sm:$0xff]  ;;  %v324_v54 = vld [vmem:[#allocation5 + $0x90] sm:$0xff] }
  0x68   : > { %1530 = vmatprep.subr.mxu1 %v362_v31  ;;  %1496 = vmatpush3.msra.mxu0 %v314_v32  ;;  %v357_v51 = vld [vmem:[#allocation5 + $0x198] sm:$0xff]  ;;  %v356_v55 = vld [vmem:[#allocation5 + $0x190] sm:$0xff]  ;;  %v323_v58 = vld [vmem:[#allocation5 + $0x88] sm:$0xff] }
  0x69   : > { %1531 = vmatpush3.msra.mxu1 %v346_v33  ;;  %1497 = vmatprep.subr.mxu0 %v329_v34  ;;  %v309_v52 = vld [vmem:[#allocation5 + $0x18] sm:$0xff]  ;;  %v308_v56 = vld [vmem:[#allocation5 + $0x10] sm:$0xff]  ;;  %v355_v59 = vld [vmem:[#allocation5 + $0x188] sm:$0xff] }
  0x6a   : > { %1532 = vmatprep.subr.mxu1 %v361_v35  ;;  %1498 = vmatpush3.msra.mxu0 %v313_v36  ;;  %v341_v53 = vld [vmem:[#allocation5 + $0x118] sm:$0xff]  ;;  %v340_v57 = vld [vmem:[#allocation5 + $0x110] sm:$0xff]  ;;  %v307_v60 = vld [vmem:[#allocation5 + $0x8] sm:$0xff] }
  0x6b   : > { %1533 = vmatpush3.msra.mxu1 %v345_v37  ;;  %1499 = vmatprep.subr.mxu0 %v328_v38  ;;  %v339_v61 = vld [vmem:[#allocation5 + $0x108] sm:$0xff]  ;;  %v322_v62 = vld [vmem:[#allocation5 + $0x80] sm:$0xff]  ;;  %v301_v5 = vld [vmem:[%s2032_s10 + $0x18] sm:$0xff] }
  0x6c   : > { %1534 = vmatprep.subr.mxu1 %v360_v39  ;;  %1500 = vmatpush3.msra.mxu0 %v312_v40  ;;  %v354_v63 = vld [vmem:[#allocation5 + $0x180] sm:$0xff]  ;;  %v299_v3 = vld [vmem:[%s2032_s10 + $0x8] sm:$0xff]  ;;  %v300_v7 = vld [vmem:[%s2032_s10 + $0x10] sm:$0xff] }
  0x6d   : > { %1535 = vmatpush3.msra.mxu1 %v344_v41  ;;  %1501 = vmatprep.subr.mxu0 %v327_v42  ;;  %v306_v2 = vld [vmem:[#allocation5] sm:$0xff]  ;;  %v401_v8 = vld [vmem:[#allocation5 + $0x2f8] sm:$0xff]  ;;  %v400_v12 = vld [vmem:[#allocation5 + $0x2f0] sm:$0xff] }
  0x6e   : > { %1536 = vmatprep.subr.mxu1 %v359_v43  ;;  %1502 = vmatpush3.msra.mxu0 %v311_v44  ;;  %v338_v4 = vld [vmem:[#allocation5 + $0x100] sm:$0xff]  ;;  %v433_v9 = vld [vmem:[#allocation5 + $0x3f8] sm:$0xff]  ;;  %v432_v13 = vld [vmem:[#allocation5 + $0x3f0] sm:$0xff] }
  0x6f   : > { %1537 = vmatpush3.msra.mxu1 %v343_v45  ;;  %1503 = vmatprep.subr.mxu0 %v326_v46  ;;  %v298_v6 = vld [vmem:[%s2032_s10] sm:$0xff]  ;;  %v385_v10 = vld [vmem:[#allocation5 + $0x278] sm:$0xff]  ;;  %v384_v14 = vld [vmem:[#allocation5 + $0x270] sm:$0xff] }
  0x70   : > { %1538 = vmatprep.subr.mxu1 %v358_v47  ;;  %1504 = vmatpush3.msra.mxu0 %v310_v48  ;;  %v417_v11 = vld [vmem:[#allocation5 + $0x378] sm:$0xff]  ;;  %v416_v15 = vld [vmem:[#allocation5 + $0x370] sm:$0xff]  ;;  %v399_v16 = vld [vmem:[#allocation5 + $0x2e8] sm:$0xff] }
  0x71   : > { %1539 = vmatpush3.msra.mxu1 %v342_v49  ;;  %1505 = vmatprep.subr.mxu0 %v325_v50  ;;  %v431_v17 = vld [vmem:[#allocation5 + $0x3e8] sm:$0xff]  ;;  %v398_v20 = vld [vmem:[#allocation5 + $0x2e0] sm:$0xff]  ;;  %v397_v24 = vld [vmem:[#allocation5 + $0x2d8] sm:$0xff] }
  0x72   : > { %1540 = vmatprep.subr.mxu1 %v357_v51  ;;  %1506 = vmatpush3.msra.mxu0 %v309_v52  ;;  %v383_v18 = vld [vmem:[#allocation5 + $0x268] sm:$0xff]  ;;  %v430_v21 = vld [vmem:[#allocation5 + $0x3e0] sm:$0xff]  ;;  %v429_v25 = vld [vmem:[#allocation5 + $0x3d8] sm:$0xff] }
  0x73   : > { %1541 = vmatpush3.msra.mxu1 %v341_v53  ;;  %1507 = vmatprep.subr.mxu0 %v324_v54  ;;  %v415_v19 = vld [vmem:[#allocation5 + $0x368] sm:$0xff]  ;;  %v382_v22 = vld [vmem:[#allocation5 + $0x260] sm:$0xff]  ;;  %v381_v26 = vld [vmem:[#allocation5 + $0x258] sm:$0xff] }
  0x74   : > { %1542 = vmatprep.subr.mxu1 %v356_v55  ;;  %1508 = vmatpush3.msra.mxu0 %v308_v56  ;;  %v414_v23 = vld [vmem:[#allocation5 + $0x360] sm:$0xff]  ;;  %v413_v27 = vld [vmem:[#allocation5 + $0x358] sm:$0xff]  ;;  %v396_v28 = vld [vmem:[#allocation5 + $0x2d0] sm:$0xff] }
  0x75   : > { %1543 = vmatpush3.msra.mxu1 %v340_v57  ;;  %1509 = vmatprep.subr.mxu0 %v323_v58  ;;  %v428_v29 = vld [vmem:[#allocation5 + $0x3d0] sm:$0xff]  ;;  %v395_v32 = vld [vmem:[#allocation5 + $0x2c8] sm:$0xff]  ;;  %v394_v36 = vld [vmem:[#allocation5 + $0x2c0] sm:$0xff] }
  0x76   : > { %1544 = vmatprep.subr.mxu1 %v355_v59  ;;  %1510 = vmatpush3.msra.mxu0 %v307_v60  ;;  %v380_v30 = vld [vmem:[#allocation5 + $0x250] sm:$0xff]  ;;  %v427_v33 = vld [vmem:[#allocation5 + $0x3c8] sm:$0xff]  ;;  %v426_v37 = vld [vmem:[#allocation5 + $0x3c0] sm:$0xff] }
  0x77   : > { %1545 = vmatpush3.msra.mxu1 %v339_v61  ;;  %1511 = vmatprep.subr.mxu0 %v322_v62  ;;  %v412_v31 = vld [vmem:[#allocation5 + $0x350] sm:$0xff]  ;;  %v379_v34 = vld [vmem:[#allocation5 + $0x248] sm:$0xff]  ;;  %v378_v38 = vld [vmem:[#allocation5 + $0x240] sm:$0xff] }
  0x78   : > { %1546 = vmatprep.subr.mxu1 %v354_v63  ;;  %1512 = vmatpush3.msra.mxu0 %v306_v2  ;;  %v411_v35 = vld [vmem:[#allocation5 + $0x348] sm:$0xff]  ;;  %v410_v39 = vld [vmem:[#allocation5 + $0x340] sm:$0xff]  ;;  %v393_v40 = vld [vmem:[#allocation5 + $0x2b8] sm:$0xff] }
  0x79   : > { %632 = vmatprep.mubr.f32.mxu0 %v299_v3  ;;  %1547 = vmatpush3.msra.mxu1 %v338_v4  ;;  %v425_v41 = vld [vmem:[#allocation5 + $0x3b8] sm:$0xff]  ;;  %v392_v44 = vld [vmem:[#allocation5 + $0x2b0] sm:$0xff]  ;;  %v391_v48 = vld [vmem:[#allocation5 + $0x2a8] sm:$0xff] }
  0x7a   : > { %702 = vmatprep.mubr.f32.mxu1 %v301_v5  ;;  %633 = vmatmul.mubr.f32.vlgmr.msra.gmra.mxu0 %v298_v6  ;;  %v377_v42 = vld [vmem:[#allocation5 + $0x238] sm:$0xff]  ;;  %v424_v45 = vld [vmem:[#allocation5 + $0x3b0] sm:$0xff]  ;;  %v423_v49 = vld [vmem:[#allocation5 + $0x3a8] sm:$0xff] }
  0x7b   : > { %703 = vmatmul.mubr.f32.vlgmr.msra.gmra.mxu1 %v300_v7  ;;  %1551 = vmatprep.subr.mxu0 %v401_v8  ;;  %v409_v43 = vld [vmem:[#allocation5 + $0x338] sm:$0xff]  ;;  %v376_v46 = vld [vmem:[#allocation5 + $0x230] sm:$0xff]  ;;  %v375_v50 = vld [vmem:[#allocation5 + $0x228] sm:$0xff] }
  0x7c   : > { %1586 = vmatprep.subr.mxu1 %v433_v9  ;;  %1552 = vmatpush3.msra.mxu0 %v385_v10  ;;  %v408_v47 = vld [vmem:[#allocation5 + $0x330] sm:$0xff]  ;;  %v407_v51 = vld [vmem:[#allocation5 + $0x328] sm:$0xff]  ;;  %v390_v52 = vld [vmem:[#allocation5 + $0x2a0] sm:$0xff] }
  0x7d   : > { %1587 = vmatpush3.msra.mxu1 %v417_v11  ;;  %1553 = vmatprep.subr.mxu0 %v400_v12  ;;  %v422_v53 = vld [vmem:[#allocation5 + $0x3a0] sm:$0xff]  ;;  %v389_v56 = vld [vmem:[#allocation5 + $0x298] sm:$0xff]  ;;  %v388_v60 = vld [vmem:[#allocation5 + $0x290] sm:$0xff] }
  0x7e   : > { %1588 = vmatprep.subr.mxu1 %v432_v13  ;;  %1554 = vmatpush3.msra.mxu0 %v384_v14  ;;  %v374_v54 = vld [vmem:[#allocation5 + $0x220] sm:$0xff]  ;;  %v421_v57 = vld [vmem:[#allocation5 + $0x398] sm:$0xff]  ;;  %v420_v61 = vld [vmem:[#allocation5 + $0x390] sm:$0xff] }
  0x7f   : > { %1589 = vmatpush3.msra.mxu1 %v416_v15  ;;  %1555 = vmatprep.subr.mxu0 %v399_v16  ;;  %v406_v55 = vld [vmem:[#allocation5 + $0x320] sm:$0xff]  ;;  %v373_v58 = vld [vmem:[#allocation5 + $0x218] sm:$0xff]  ;;  %v372_v62 = vld [vmem:[#allocation5 + $0x210] sm:$0xff]  ;;  %v1869_v15 = vmov 3   ;;  %v1870_v16 = vmov 1  }
  0x80   : > { %1590 = vmatprep.subr.mxu1 %v431_v17  ;;  %1556 = vmatpush3.msra.mxu0 %v383_v18  ;;  %v405_v59 = vld [vmem:[#allocation5 + $0x318] sm:$0xff]  ;;  %v404_v63 = vld [vmem:[#allocation5 + $0x310] sm:$0xff]  ;;  %v387_v2 = vld [vmem:[#allocation5 + $0x288] sm:$0xff] }
  0x81   : > { %1591 = vmatpush3.msra.mxu1 %v415_v19  ;;  %1557 = vmatprep.subr.mxu0 %v398_v20  ;;  %v419_v3 = vld [vmem:[#allocation5 + $0x388] sm:$0xff]  ;;  %v386_v6 = vld [vmem:[#allocation5 + $0x280] sm:$0xff]  ;;  %v305_v11 = vld [vmem:[%s2032_s10 + $0x38] sm:$0xff] }
  0x82   : > { %1592 = vmatprep.subr.mxu1 %v430_v21  ;;  %1558 = vmatpush3.msra.mxu0 %v382_v22  ;;  %v371_v4 = vld [vmem:[#allocation5 + $0x208] sm:$0xff]  ;;  %v418_v7 = vld [vmem:[#allocation5 + $0x380] sm:$0xff]  ;;  %v304_v13 = vld [vmem:[%s2032_s10 + $0x30] sm:$0xff] }
  0x83   : > { %1593 = vmatpush3.msra.mxu1 %v414_v23  ;;  %1559 = vmatprep.subr.mxu0 %v397_v24  ;;  %v403_v5 = vld [vmem:[#allocation5 + $0x308] sm:$0xff]  ;;  %v370_v8 = vld [vmem:[#allocation5 + $0x200] sm:$0xff]  ;;  %v557_v21 = vld [vmem:[#allocation7 + $0x3d8] sm:$0xff] }
  0x84   : > { %1594 = vmatprep.subr.mxu1 %v429_v25  ;;  %1560 = vmatpush3.msra.mxu0 %v381_v26  ;;  %v303_v9 = vld [vmem:[%s2032_s10 + $0x28] sm:$0xff]  ;;  %v402_v10 = vld [vmem:[#allocation5 + $0x300] sm:$0xff]  ;;  %v556_v23 = vld [vmem:[#allocation7 + $0x3d0] sm:$0xff] }
  0x85   : > { %1595 = vmatpush3.msra.mxu1 %v413_v27  ;;  %1561 = vmatprep.subr.mxu0 %v396_v28  ;;  %v302_v12 = vld [vmem:[%s2032_s10 + $0x20] sm:$0xff]  ;;  %v563_v18 = vld [vmem:[%s2210_s2 + $0x8] sm:$0xff]  ;;  %v549_v25 = vld [vmem:[#allocation7 + $0x398] sm:$0xff]  ;;  %s1480_s10 = sshll.u32 %s1931_s25, 12  ;;  %s1353_s25 = scalar_lea.sflag [#allocation4], %s2028_s20 }
  0x86   : > { %1596 = vmatprep.subr.mxu1 %v428_v29  ;;  %1562 = vmatpush3.msra.mxu0 %v380_v30  ;;  %v562_v14 = vld [vmem:[%s2210_s2] sm:$0xff]  ;;  %v565_v19 = vld [vmem:[%s2211_s3 + $0x8] sm:$0xff]  ;;  %v548_v26 = vld [vmem:[#allocation7 + $0x390] sm:$0xff]  ;;  %s2159_s15 = scalar_lea.hbm %s2214_s6, %s1480_s10 }
  0x87   : > { %1597 = vmatpush3.msra.mxu1 %v412_v31  ;;  %1563 = vmatprep.subr.mxu0 %v395_v32  ;;  %v564_v17 = vld [vmem:[%s2211_s3] sm:$0xff]  ;;  %v555_v20 = vld [vmem:[#allocation7 + $0x3c8] sm:$0xff]  ;;  %v541_v28 = vld [vmem:[#allocation7 + $0x358] sm:$0xff] }
  0x88   : > { %1598 = vmatprep.subr.mxu1 %v427_v33  ;;  %1564 = vmatpush3.msra.mxu0 %v379_v34  ;;  %v554_v22 = vld [vmem:[#allocation7 + $0x3c0] sm:$0xff]  ;;  %v547_v24 = vld [vmem:[#allocation7 + $0x388] sm:$0xff]  ;;  %v540_v30 = vld [vmem:[#allocation7 + $0x350] sm:$0xff] }
  0x89   : > { %1599 = vmatpush3.msra.mxu1 %v411_v35  ;;  %1565 = vmatprep.subr.mxu0 %v394_v36  ;;  %v539_v27 = vld [vmem:[#allocation7 + $0x348] sm:$0xff]  ;;  %v538_v29 = vld [vmem:[#allocation7 + $0x340] sm:$0xff]  ;;  %v533_v31 = vld [vmem:[#allocation7 + $0x318] sm:$0xff] }
  0x8a   : > { %1600 = vmatprep.subr.mxu1 %v426_v37  ;;  %1566 = vmatpush3.msra.mxu0 %v378_v38  ;;  %v530_v32 = vld [vmem:[#allocation7 + $0x300] sm:$0xff]  ;;  %v532_v33 = vld [vmem:[#allocation7 + $0x310] sm:$0xff]  ;;  %v523_v34 = vld [vmem:[#allocation7 + $0x2c8] sm:$0xff] }
  0x8b   : > { %1601 = vmatpush3.msra.mxu1 %v410_v39  ;;  %1567 = vmatprep.subr.mxu0 %v393_v40  ;;  %v525_v35 = vld [vmem:[#allocation7 + $0x2d8] sm:$0xff]  ;;  %v522_v36 = vld [vmem:[#allocation7 + $0x2c0] sm:$0xff]  ;;  %v524_v37 = vld [vmem:[#allocation7 + $0x2d0] sm:$0xff] }
  0x8c   : > { %1602 = vmatprep.subr.mxu1 %v425_v41  ;;  %1568 = vmatpush3.msra.mxu0 %v377_v42  ;;  %v515_v38 = vld [vmem:[#allocation7 + $0x288] sm:$0xff]  ;;  %v517_v39 = vld [vmem:[#allocation7 + $0x298] sm:$0xff]  ;;  %v514_v40 = vld [vmem:[#allocation7 + $0x280] sm:$0xff] }
  0x8d   : > { %1603 = vmatpush3.msra.mxu1 %v409_v43  ;;  %1569 = vmatprep.subr.mxu0 %v392_v44  ;;  %v516_v41 = vld [vmem:[#allocation7 + $0x290] sm:$0xff]  ;;  %v507_v42 = vld [vmem:[#allocation7 + $0x248] sm:$0xff]  ;;  %v509_v43 = vld [vmem:[#allocation7 + $0x258] sm:$0xff] }
  0x8e   : > { %1604 = vmatprep.subr.mxu1 %v424_v45  ;;  %1570 = vmatpush3.msra.mxu0 %v376_v46  ;;  %v506_v44 = vld [vmem:[#allocation7 + $0x240] sm:$0xff]  ;;  %v508_v45 = vld [vmem:[#allocation7 + $0x250] sm:$0xff]  ;;  %v499_v46 = vld [vmem:[#allocation7 + $0x208] sm:$0xff] }
  0x8f   : > { %1605 = vmatpush3.msra.mxu1 %v408_v47  ;;  %1571 = vmatprep.subr.mxu0 %v391_v48  ;;  %v501_v47 = vld [vmem:[#allocation7 + $0x218] sm:$0xff]  ;;  %v498_v48 = vld [vmem:[#allocation7 + $0x200] sm:$0xff] }
  0x90   : > { %1606 = vmatprep.subr.mxu1 %v423_v49  ;;  %1572 = vmatpush3.msra.mxu0 %v375_v50  ;;  %v500_v49 = vld [vmem:[#allocation7 + $0x210] sm:$0xff]  ;;  %v491_v50 = vld [vmem:[#allocation7 + $0x1c8] sm:$0xff] }
  0x91   : > { %1607 = vmatpush3.msra.mxu1 %v407_v51  ;;  %1573 = vmatprep.subr.mxu0 %v390_v52  ;;  %v493_v51 = vld [vmem:[#allocation7 + $0x1d8] sm:$0xff]  ;;  %v490_v52 = vld [vmem:[#allocation7 + $0x1c0] sm:$0xff] }
  0x92   : > { %1608 = vmatprep.subr.mxu1 %v422_v53  ;;  %1574 = vmatpush3.msra.mxu0 %v374_v54  ;;  %v492_v53 = vld [vmem:[#allocation7 + $0x1d0] sm:$0xff]  ;;  %v483_v54 = vld [vmem:[#allocation7 + $0x188] sm:$0xff] }
  0x93   : > { %1609 = vmatpush3.msra.mxu1 %v406_v55  ;;  %1575 = vmatprep.subr.mxu0 %v389_v56  ;;  %v485_v55 = vld [vmem:[#allocation7 + $0x198] sm:$0xff]  ;;  %v482_v56 = vld [vmem:[#allocation7 + $0x180] sm:$0xff] }
  0x94   : > { %1610 = vmatprep.subr.mxu1 %v421_v57  ;;  %1576 = vmatpush3.msra.mxu0 %v373_v58  ;;  %v484_v57 = vld [vmem:[#allocation7 + $0x190] sm:$0xff]  ;;  %v475_v58 = vld [vmem:[#allocation7 + $0x148] sm:$0xff] }
  0x95   : > { %1611 = vmatpush3.msra.mxu1 %v405_v59  ;;  %1577 = vmatprep.subr.mxu0 %v388_v60  ;;  %v477_v59 = vld [vmem:[#allocation7 + $0x158] sm:$0xff]  ;;  %v474_v60 = vld [vmem:[#allocation7 + $0x140] sm:$0xff] }
  0x96   : > { %1612 = vmatprep.subr.mxu1 %v420_v61  ;;  %1578 = vmatpush3.msra.mxu0 %v372_v62  ;;  %v476_v61 = vld [vmem:[#allocation7 + $0x150] sm:$0xff]  ;;  %v467_v62 = vld [vmem:[#allocation7 + $0x108] sm:$0xff] }
  0x97   : > { %1613 = vmatpush3.msra.mxu1 %v404_v63  ;;  %1579 = vmatprep.subr.mxu0 %v387_v2  ;;  %v469_v63 = vld [vmem:[#allocation7 + $0x118] sm:$0xff]  ;;  %v466_v2 = vld [vmem:[#allocation7 + $0x100] sm:$0xff] }
  0x98   : > { %1614 = vmatprep.subr.mxu1 %v419_v3  ;;  %1580 = vmatpush3.msra.mxu0 %v371_v4  ;;  %v468_v3 = vld [vmem:[#allocation7 + $0x110] sm:$0xff]  ;;  %v459_v4 = vld [vmem:[#allocation7 + $0xc8] sm:$0xff] }
  0x99   : > { %1615 = vmatpush3.msra.mxu1 %v403_v5  ;;  %1581 = vmatprep.subr.mxu0 %v386_v6  ;;  %v461_v5 = vld [vmem:[#allocation7 + $0xd8] sm:$0xff]  ;;  %v458_v6 = vld [vmem:[#allocation7 + $0xc0] sm:$0xff] }
  0x9a   : > { %1616 = vmatprep.subr.mxu1 %v418_v7  ;;  %1582 = vmatpush3.msra.mxu0 %v370_v8  ;;  %v460_v7 = vld [vmem:[#allocation7 + $0xd0] sm:$0xff]  ;;  %v451_v8 = vld [vmem:[#allocation7 + $0x88] sm:$0xff] }
  0x9b   : > { %772 = vmatprep.mubr.f32.mxu0 %v303_v9  ;;  %1617 = vmatpush3.msra.mxu1 %v402_v10  ;;  %v453_v9 = vld [vmem:[#allocation7 + $0x98] sm:$0xff]  ;;  %v450_v10 = vld [vmem:[#allocation7 + $0x80] sm:$0xff] }
  0x9c   : > { %842 = vmatprep.mubr.f32.mxu1 %v305_v11  ;;  %773 = vmatmul.mubr.f32.vlgmr.msra.gmra.mxu0 %v302_v12  ;;  %v452_v11 = vld [vmem:[#allocation7 + $0x90] sm:$0xff]  ;;  %v443_v12 = vld [vmem:[#allocation7 + $0x48] sm:$0xff] }
  0x9d   : > { %843 = vmatmul.mubr.f32.vlgmr.msra.gmra.mxu1 %v304_v13  ;;  %881 = vperm.xlu1 %1701, %v562_v14   ;;  %v445_v13 = vld [vmem:[#allocation7 + $0x58] sm:$0xff] }
  0x9e   : > { %850 = vperm.xlu0 %1699, %v562_v14   ;;  %964 = vmatprep.subr.mxu0 %v555_v20  ;;  %v559_v20 = vld [vmem:[#allocation7 + $0x3e8] sm:$0xff] }
  0x9f   : > { %1053 = vmatprep.subr.mxu1 %v557_v21  ;;  %965 = vmatpush1.msra.mxu0 %v554_v22  ;;  %v561_v21 = vld [vmem:[#allocation7 + $0x3f8] sm:$0xff]  ;;  %v1871_v22 = vmov 0.0  }
  0xa0   : > { %1054 = vmatpush1.msra.mxu1 %v556_v23  ;;  %966 = vmatprep.subr.mxu0 %v547_v24 }
  0xa1   : > { %1702 = vset.pattern.permute.xlu1 %v1869_v15  ;;  %1055 = vmatprep.subr.mxu1 %v549_v25 }
  0xa2   : > { %1700 = vset.pattern.permute.xlu0 %v1870_v16  ;;  %897 = vperm.xlu1 %1702, %v562_v14  }
  0xa3   : > { %865 = vperm.xlu0 %1700, %v562_v14   ;;  %1056 = vmatpush1.msra.mxu1 %v548_v26  ;;  %v442_v14 = vld [vmem:[#allocation7 + $0x40] sm:$0xff] }
  0xa4   : > { %1057 = vmatprep.subr.mxu1 %v541_v28  ;;  %1028 = vmatprep.mubr.f32.mxu0 %v1871_v22 }
  0xa5   : > { %1058 = vmatpush1.msra.mxu1 %v540_v30  ;;  %1117 = vmatprep.mubr.f32.mxu1 %v1871_v22 }
  0xa6   : > { %1703 = vset.pattern.permute.xlu1 %v1868_v1  ;;  %1059 = vmatprep.subr.mxu1 %v533_v31 }
  0xa7   : > { %1704 = vset.pattern.permute.xlu0 %v1868_v1  ;;  %914 = vperm.xlu1 %1703, %v564_v17   ;;  %v437_v17 = vld [vmem:[#allocation7 + $0x18] sm:$0xff] }
  0xa8   : > { %855 = vperm.xlu0 %1704, %v563_v18   ;;  %1060 = vmatpush1.msra.mxu1 %v532_v33 }
  0xa9   : > { %1061 = vmatprep.subr.mxu1 %v525_v35 }
  0xaa   : > { %1062 = vmatpush1.msra.mxu1 %v524_v37 }
  0xab   : > { %1705 = vset.pattern.permute.xlu1 %v1870_v16  ;;  %1063 = vmatprep.subr.mxu1 %v517_v39  ;;  %v435_v16 = vld [vmem:[#allocation7 + $0x8] sm:$0xff] }
  0xac   : > { %1707 = vset.pattern.permute.xlu0 %v1869_v15  ;;  %869 = vperm.xlu1 %1705, %v563_v18   ;;  %v444_v15 = vld [vmem:[#allocation7 + $0x50] sm:$0xff] }
  0xad   : > { %901 = vperm.xlu0 %1707, %v563_v18   ;;  %1064 = vmatpush1.msra.mxu1 %v516_v41 }
  0xae   : > { %1065 = vmatprep.subr.mxu1 %v509_v43 }
  0xaf   : > { %1066 = vmatpush1.msra.mxu1 %v508_v45 }
  0xb0   : > { %1706 = vset.pattern.permute.xlu1 %v1867_v0  ;;  %v546_v0 = vld [vmem:[#allocation7 + $0x380] sm:$0xff]  ;;  %1067 = vmatprep.subr.mxu1 %v501_v47 }
  0xb1   : > { %1709 = vset.pattern.permute.xlu0 %v1868_v1  ;;  %885 = vperm.xlu1 %1706, %v563_v18   ;;  %v434_v18 = vld [vmem:[#allocation7] sm:$0xff] }
  0xb2   : > { %967 = vmatpush1.msra.mxu0 %v546_v0  ;;  %1068 = vmatpush1.msra.mxu1 %v500_v49 }
  0xb3   : > { %968 = vmatprep.subr.mxu0 %v539_v27  ;;  %1069 = vmatprep.subr.mxu1 %v493_v51 }
  0xb4   : > { %969 = vmatpush1.msra.mxu0 %v538_v29  ;;  %1070 = vmatpush1.msra.mxu1 %v492_v53  ;;  %v858_v29 = vlaneseq }
  0xb5   : > { %1708 = vset.pattern.permute.xlu1 %v1868_v1  ;;  %v531_v1 = vld [vmem:[#allocation7 + $0x308] sm:$0xff]  ;;  %1071 = vmatprep.subr.mxu1 %v485_v55 }
  0xb6   : > { %919 = vperm.xlu1 %1708, %v565_v19   ;;  %970 = vmatprep.subr.mxu0 %v531_v1  ;;  %v436_v19 = vld [vmem:[#allocation7 + $0x10] sm:$0xff] }
  0xb7   : > { %971 = vmatpush1.msra.mxu0 %v530_v32  ;;  %1072 = vmatpush1.msra.mxu1 %v484_v57 }
  0xb8   : > { %972 = vmatprep.subr.mxu0 %v523_v34  ;;  %1073 = vmatprep.subr.mxu1 %v477_v59  ;;  %v859_v34 = vshrl.u32 %v858_v29, 7 }
  0xb9   : > { %973 = vmatpush1.msra.mxu0 %v522_v36  ;;  %1074 = vmatpush1.msra.mxu1 %v476_v61 }
  0xba   : > { %974 = vmatprep.subr.mxu0 %v515_v38  ;;  %1075 = vmatprep.subr.mxu1 %v469_v63  ;;  %v936_v41 = vsub.s32 5, %v859_v34  ;;  %v860_v45 = vsub.s32 0, %v859_v34  ;;  %v890_v47 = vsub.s32 2, %v859_v34  ;;  %v906_v51 = vsub.s32 3, %v859_v34 }
  0xbb   : > { %975 = vmatpush1.msra.mxu0 %v514_v40  ;;  %1076 = vmatpush1.msra.mxu1 %v468_v3  ;;  %v874_v40 = vsub.s32 1, %v859_v34 }
  0xbc   : > { %976 = vmatprep.subr.mxu0 %v507_v42  ;;  %1077 = vmatprep.subr.mxu1 %v461_v5 }
  0xbd   : > { %977 = vmatpush1.msra.mxu0 %v506_v44  ;;  %1078 = vmatpush1.msra.mxu1 %v460_v7 }
  0xbe   : > { %978 = vmatprep.subr.mxu0 %v499_v46  ;;  %1079 = vmatprep.subr.mxu1 %v453_v9  ;;  %v930_v46 = vsub.s32 4, %v859_v34 }
  0xbf   : > { %979 = vmatpush1.msra.mxu0 %v498_v48  ;;  %1080 = vmatpush1.msra.mxu1 %v452_v11 }
  0xc0   : > { %980 = vmatprep.subr.mxu0 %v491_v50  ;;  %1081 = vmatprep.subr.mxu1 %v445_v13  ;;  %v944_v50 = vsub.s32 6, %v859_v34 }
  0xc1   : > { %981 = vmatpush1.msra.mxu0 %v490_v52  ;;  %1082 = vmatpush1.msra.mxu1 %v444_v15 }
  0xc2   : > { %982 = vmatprep.subr.mxu0 %v483_v54  ;;  %1083 = vmatprep.subr.mxu1 %v437_v17 }
  0xc3   : > { %983 = vmatpush1.msra.mxu0 %v482_v56  ;;  %1084 = vmatpush1.msra.mxu1 %v436_v19 }
  0xc4   : > { %984 = vmatprep.subr.mxu0 %v475_v58  ;;  %1231 = vmatprep.subr.mxu1 %v561_v21 }
  0xc5   : > { %985 = vmatpush1.msra.mxu0 %v474_v60 }
  0xc6   : > { %986 = vmatprep.subr.mxu0 %v467_v62 }
  0xc7   : > { %987 = vmatpush1.msra.mxu0 %v466_v2 }
  0xc8   : > { %988 = vmatprep.subr.mxu0 %v459_v4  ;;  %v952_v4 = vsub.s32 7, %v859_v34  ;;  %v560_v34 = vld [vmem:[#allocation7 + $0x3f0] sm:$0xff] }
  0xc9   : > { %989 = vmatpush1.msra.mxu0 %v458_v6 }
  0xca   : > { %990 = vmatprep.subr.mxu0 %v451_v8 }
  0xcb   : > { %991 = vmatpush1.msra.mxu0 %v450_v10 }
  0xcc   : > { %992 = vmatprep.subr.mxu0 %v443_v12 }
  0xcd   : > { %993 = vmatpush1.msra.mxu0 %v442_v14 }
  0xce   : > { %994 = vmatprep.subr.mxu0 %v435_v16 }
  0xcf   : > { %995 = vmatpush1.msra.mxu0 %v434_v18 }
  0xd0   : > { %1142 = vmatprep.subr.mxu0 %v559_v20 }
 0x118   : > { %v882_v23 = vpop.permute.xlu1 %881 }
 0x119   : > { %v851_v26 = vpop.permute.xlu0 %850 }
 0x11d   : > { %v2071_v0 = vpop.permute.xlu1 %897 }
 0x11e   : > { %v866_v35 = vpop.permute.xlu0 %865 }
 0x122   : > { %v2073_v31 = vpop.permute.xlu1 %914 }
 0x123   : > { %v856_v49 = vpop.permute.xlu0 %855 }
 0x127   : > { %v870_v44 = vpop.permute.xlu1 %869 }
 0x128   : > { %v902_v5 = vpop.permute.xlu0 %901 }
 0x12c   : > { %v886_v60 = vpop.permute.xlu1 %885 }
 0x131   : > { %v920_v21 = vpop.permute.xlu1 %919 }
 0x13a   : > { %v1513_v24 = vpop.f32.mrf.mxu0 }
 0x13b   : > { %v1548_v25 = vpop.f32.mrf.mxu1 }
 0x13c   : > { %v1514_v27 = vpop.f32.mrf.mxu0 }
 0x13d   : > { %v1549_v28 = vpop.f32.mrf.mxu1  ;;  %v1515_v30 = vadd.f32 %v1514_v27, %v1513_v24 }
 0x13e   : > { %v1550_v1 = vadd.f32 %v1549_v28, %v1548_v25 }
 0x140   : > { %v705_v38 = vadd.f32 %v1550_v1, %v1515_v30 }
 0x15c   : > { %v1583_v32 = vpop.f32.mrf.mxu0 }
 0x15d   : > { %v1618_v33 = vpop.f32.mrf.mxu1 }
 0x15e   : > { %v1584_v36 = vpop.f32.mrf.mxu0 }
 0x15f   : > { %v1619_v37 = vpop.f32.mrf.mxu1  ;;  %v1585_v39 = vadd.f32 %v1584_v36, %v1583_v32  ;;  %v553_v36 = vld [vmem:[#allocation7 + $0x3b8] sm:$0xff] }
 0x160   : > { %v1620_v43 = vadd.f32 %v1619_v37, %v1618_v33 }
 0x161   : > { %v775_v42 = vadd.f32 %v1585_v39, %v705_v38  ;;  %v550_v39 = vld [vmem:[#allocation7 + $0x3a0] sm:$0xff] }
 0x163   : > { %v845_v48 = vadd.f32 %v1620_v43, %v775_v42  ;;  %v543_v43 = vld [vmem:[#allocation7 + $0x368] sm:$0xff] }
 0x165   : > { %v875_v52 = vrot.slane %v845_v48, %v874_v40  ;;  %v937_v53 = vrot.slane %v845_v48, %v936_v41  ;;  %v861_v54 = vrot.slane %v845_v48, %v860_v45  ;;  %v931_v55 = vrot.slane %v845_v48, %v930_v46  ;;  %v552_v40 = vld [vmem:[#allocation7 + $0x3b0] sm:$0xff] }
 0x166   : > { %v891_v56 = vrot.slane %v845_v48, %v890_v47  ;;  %v907_v2 = vrot.slane %v845_v48, %v906_v51  ;;  %v945_v3 = vrot.slane %v845_v48, %v944_v50  ;;  %v953_v16 = vrot.slane %v845_v48, %v952_v4  ;;  %v542_v47 = vld [vmem:[#allocation7 + $0x360] sm:$0xff]  ;;  %v544_v48 = vld [vmem:[#allocation7 + $0x370] sm:$0xff]  ;;  %v537_v50 = vld [vmem:[#allocation7 + $0x338] sm:$0xff] }
 0x167   : > { %v876_v57 = vmul.f32 %v875_v52, %v866_v35  ;;  %v877_v58 = vmul.f32 %v875_v52, %v870_v44  ;;  %v938_v59 = vmul.f32 %v937_v53, %v866_v35  ;;  %v862_v61 = vmul.f32 %v861_v54, %v851_v26  ;;  %v551_v35 = vld [vmem:[#allocation7 + $0x3a8] sm:$0xff]  ;;  %v534_v51 = vld [vmem:[#allocation7 + $0x320] sm:$0xff]  ;;  %v536_v52 = vld [vmem:[#allocation7 + $0x330] sm:$0xff] }
 0x168   : > { %v863_v62 = vmul.f32 %v861_v54, %v856_v49  ;;  %v932_v63 = vmul.f32 %v931_v55, %v851_v26  ;;  %v892_v8 = vmul.f32 %v891_v56, %v882_v23  ;;  %v893_v9 = vmul.f32 %v891_v56, %v886_v60  ;;  %v566_v26 = vld [vmem:[%s2212_s4] sm:$0xff]  ;;  %v527_v54 = vld [vmem:[#allocation7 + $0x2e8] sm:$0xff] }
 0x169   : > { %v878_v6 = vadd.f32 %v876_v57, %v862_v61  ;;  %v908_v13 = vmul.f32 %v907_v2, %v2071_v0  ;;  %v909_v14 = vmul.f32 %v907_v2, %v902_v5  ;;  %v939_v15 = vmul.f32 %v937_v53, %v870_v44  ;;  %v545_v44 = vld [vmem:[#allocation7 + $0x378] sm:$0xff]  ;;  %v526_v57 = vld [vmem:[#allocation7 + $0x2e0] sm:$0xff]  ;;  %v511_v2 = vld [vmem:[#allocation7 + $0x268] sm:$0xff] }
 0x16a   : > { %v879_v7 = vadd.f32 %v877_v58, %v863_v62  ;;  %v940_v10 = vadd.f32 %v938_v59, %v932_v63  ;;  %v933_v17 = vmul.f32 %v931_v55, %v856_v49  ;;  %v946_v18 = vmul.f32 %v945_v3, %v882_v23  ;;  %v558_v23 = vld [vmem:[#allocation7 + $0x3e0] sm:$0xff]  ;;  %v535_v49 = vld [vmem:[#allocation7 + $0x328] sm:$0xff]  ;;  %v529_v55 = vld [vmem:[#allocation7 + $0x2f8] sm:$0xff] }
 0x16b   : > { %v894_v11 = vadd.f32 %v892_v8, %v878_v6  ;;  %v954_v29 = vmul.f32 %v953_v16, %v2071_v0  ;;  %v947_v1 = vmul.f32 %v945_v3, %v886_v60  ;;  %v567_v0 = vld [vmem:[%s2212_s4 + $0x8] sm:$0xff]  ;;  %v955_v41 = vmul.f32 %v953_v16, %v902_v5  ;;  %v528_v58 = vld [vmem:[#allocation7 + $0x2f0] sm:$0xff]  ;;  %v521_v60 = vld [vmem:[#allocation7 + $0x2b8] sm:$0xff] }
 0x16c   : > { %v895_v12 = vadd.f32 %v893_v9, %v879_v7  ;;  %v948_v24 = vadd.f32 %v946_v18, %v940_v10  ;;  %v941_v27 = vadd.f32 %v939_v15, %v933_v17  ;;  %v519_v59 = vld [vmem:[#allocation7 + $0x2a8] sm:$0xff]  ;;  %v518_v62 = vld [vmem:[#allocation7 + $0x2a0] sm:$0xff]  ;;  %v520_v63 = vld [vmem:[#allocation7 + $0x2b0] sm:$0xff] }
 0x16d   : > { %v910_v19 = vadd.f32 %v908_v13, %v894_v11  ;;  %v513_v3 = vld [vmem:[#allocation7 + $0x278] sm:$0xff]  ;;  %v510_v5 = vld [vmem:[#allocation7 + $0x260] sm:$0xff]  ;;  %v512_v6 = vld [vmem:[#allocation7 + $0x270] sm:$0xff] }
 0x16e   : > { %v911_v20 = vadd.f32 %v909_v14, %v895_v12  ;;  %v956_v32 = vadd.f32 %v954_v29, %v948_v24  ;;  %v949_v37 = vadd.f32 %v947_v1, %v941_v27  ;;  %v503_v7 = vld [vmem:[#allocation7 + $0x228] sm:$0xff]  ;;  %v505_v8 = vld [vmem:[#allocation7 + $0x238] sm:$0xff]  ;;  %v502_v9 = vld [vmem:[#allocation7 + $0x220] sm:$0xff] }
 0x16f   : > { %v922_v25 = vadd.f32 %v2073_v31, %v910_v19  ;;  %v504_v10 = vld [vmem:[#allocation7 + $0x230] sm:$0xff]  ;;  %v495_v11 = vld [vmem:[#allocation7 + $0x1e8] sm:$0xff]  ;;  %v497_v12 = vld [vmem:[#allocation7 + $0x1f8] sm:$0xff] }
 0x170   : > { %v923_v30 = vadd.f32 %v920_v21, %v911_v20  ;;  %v958_v42 = vadd.f32 %v956_v32, %v2073_v31  ;;  %v957_v46 = vadd.f32 %v955_v41, %v949_v37  ;;  %v494_v13 = vld [vmem:[#allocation7 + $0x1e0] sm:$0xff]  ;;  %v496_v14 = vld [vmem:[#allocation7 + $0x1f0] sm:$0xff]  ;;  %v487_v15 = vld [vmem:[#allocation7 + $0x1a8] sm:$0xff] }
 0x171   : > { %v924_v28 = vmax.f32 %v922_v25, 0.0  ;;  %v489_v16 = vld [vmem:[#allocation7 + $0x1b8] sm:$0xff]  ;;  %v486_v17 = vld [vmem:[#allocation7 + $0x1a0] sm:$0xff]  ;;  %v488_v18 = vld [vmem:[#allocation7 + $0x1b0] sm:$0xff] }
 0x172   : > { %v925_v38 = vmax.f32 %v923_v30, 0.0  ;;  %v960_v31 = vmax.f32 %v958_v42, 0.0  ;;  %v959_v53 = vadd.f32 %v957_v46, %v920_v21  ;;  %v479_v19 = vld [vmem:[#allocation7 + $0x168] sm:$0xff]  ;;  %v481_v20 = vld [vmem:[#allocation7 + $0x178] sm:$0xff]  ;;  %v478_v21 = vld [vmem:[#allocation7 + $0x160] sm:$0xff] }
 0x173   : > { %v2081_v33 = vmul.f32 %v924_v28, %v566_v26  ;;  %v480_v24 = vld [vmem:[#allocation7 + $0x170] sm:$0xff]  ;;  %v471_v25 = vld [vmem:[#allocation7 + $0x128] sm:$0xff]  ;;  %v470_v27 = vld [vmem:[#allocation7 + $0x120] sm:$0xff] }
 0x174   : > { %v2089_v45 = vmul.f32 %v925_v38, %v567_v0  ;;  %v2097_v56 = vmul.f32 %v960_v31, %v566_v26  ;;  %v961_v61 = vmax.f32 %v959_v53, 0.0  ;;  %v473_v26 = vld [vmem:[#allocation7 + $0x138] sm:$0xff]  ;;  %v472_v28 = vld [vmem:[#allocation7 + $0x130] sm:$0xff]  ;;  %v463_v29 = vld [vmem:[#allocation7 + $0xe8] sm:$0xff] }
 0x175   : > { %1029 = vmatmul.mubr.f32.vlgmr.msra.gmra.mxu0 %v2081_v33  ;;  %1118 = vmatmul.mubr.f32.vlgmr.msra.gmra.mxu1 %v2081_v33  ;;  %v465_v30 = vld [vmem:[#allocation7 + $0xf8] sm:$0xff]  ;;  %v462_v1 = vld [vmem:[#allocation7 + $0xe0] sm:$0xff]  ;;  %v464_v32 = vld [vmem:[#allocation7 + $0xf0] sm:$0xff] }
 0x176   : > { %1143 = vmatpush1.msra.mxu0 %v558_v23  ;;  %1232 = vmatpush1.msra.mxu1 %v560_v34  ;;  %v2101_v4 = vmul.f32 %v961_v61, %v567_v0  ;;  %v455_v23 = vld [vmem:[#allocation7 + $0xa8] sm:$0xff]  ;;  %v457_v34 = vld [vmem:[#allocation7 + $0xb8] sm:$0xff]  ;;  %v438_v42 = vld [vmem:[#allocation7 + $0x20] sm:$0xff] }
 0x177   : > { %1144 = vmatprep.subr.mxu0 %v551_v35  ;;  %1233 = vmatprep.subr.mxu1 %v553_v36  ;;  %v454_v35 = vld [vmem:[#allocation7 + $0xa0] sm:$0xff]  ;;  %v456_v36 = vld [vmem:[#allocation7 + $0xb0] sm:$0xff]  ;;  %v447_v37 = vld [vmem:[#allocation7 + $0x68] sm:$0xff] }
 0x178   : > { %1145 = vmatpush1.msra.mxu0 %v550_v39  ;;  %1234 = vmatpush1.msra.mxu1 %v552_v40  ;;  %v449_v38 = vld [vmem:[#allocation7 + $0x78] sm:$0xff]  ;;  %v446_v39 = vld [vmem:[#allocation7 + $0x60] sm:$0xff]  ;;  %v448_v40 = vld [vmem:[#allocation7 + $0x70] sm:$0xff] }
 0x179   : > { %1034 = vmatprep.mubr.f32.mxu0 %v1871_v22  ;;  %1123 = vmatprep.mubr.f32.mxu1 %v1871_v22  ;;  %v439_v0 = vld [vmem:[#allocation7 + $0x28] sm:$0xff]  ;;  %v441_v41 = vld [vmem:[#allocation7 + $0x38] sm:$0xff] }
 0x17a   : > { %1146 = vmatprep.subr.mxu0 %v543_v43  ;;  %1235 = vmatprep.subr.mxu1 %v545_v44  ;;  %v440_v43 = vld [vmem:[#allocation7 + $0x30] sm:$0xff] }
 0x17b   : > { %1035 = vmatmul.mubr.f32.gmra.mxu0 %v2089_v45  ;;  %1124 = vmatmul.mubr.f32.gmra.mxu1 %v2089_v45 }
 0x17c   : > { %1147 = vmatpush1.msra.mxu0 %v542_v47  ;;  %1236 = vmatpush1.msra.mxu1 %v544_v48 }
 0x17d   : > { %1148 = vmatprep.subr.mxu0 %v535_v49  ;;  %1237 = vmatprep.subr.mxu1 %v537_v50 }
 0x17e   : > { %1149 = vmatpush1.msra.mxu0 %v534_v51  ;;  %1238 = vmatpush1.msra.mxu1 %v536_v52 }
 0x17f   : > { %1040 = vmatprep.mubr.f32.mxu0 %v1871_v22  ;;  %1129 = vmatprep.mubr.f32.mxu1 %v1871_v22 }
 0x180   : > { %1150 = vmatprep.subr.mxu0 %v527_v54  ;;  %1239 = vmatprep.subr.mxu1 %v529_v55 }
 0x181   : > { %1041 = vmatmul.mubr.f32.gmra.mxu0 %v2097_v56  ;;  %1130 = vmatmul.mubr.f32.gmra.mxu1 %v2097_v56 }
 0x182   : > { %1151 = vmatpush1.msra.mxu0 %v526_v57  ;;  %1240 = vmatpush1.msra.mxu1 %v528_v58 }
 0x183   : > { %1152 = vmatprep.subr.mxu0 %v519_v59  ;;  %1241 = vmatprep.subr.mxu1 %v521_v60 }
 0x184   : > { %1153 = vmatpush1.msra.mxu0 %v518_v62  ;;  %1242 = vmatpush1.msra.mxu1 %v520_v63 }
 0x185   : > { %1046 = vmatprep.mubr.f32.mxu0 %v1871_v22  ;;  %1135 = vmatprep.mubr.f32.mxu1 %v1871_v22 }
 0x186   : > { %1154 = vmatprep.subr.mxu0 %v511_v2  ;;  %1243 = vmatprep.subr.mxu1 %v513_v3 }
 0x187   : > { %1047 = vmatmul.mubr.f32.gmra.mxu0 %v2101_v4  ;;  %1136 = vmatmul.mubr.f32.gmra.mxu1 %v2101_v4 }
 0x188   : > { %1155 = vmatpush1.msra.mxu0 %v510_v5  ;;  %1244 = vmatpush1.msra.mxu1 %v512_v6 }
 0x189   : > { %1156 = vmatprep.subr.mxu0 %v503_v7  ;;  %1245 = vmatprep.subr.mxu1 %v505_v8 }
 0x18a   : > { %1157 = vmatpush1.msra.mxu0 %v502_v9  ;;  %1246 = vmatpush1.msra.mxu1 %v504_v10 }
 0x18b   : > { %1158 = vmatprep.subr.mxu0 %v495_v11  ;;  %1247 = vmatprep.subr.mxu1 %v497_v12 }
 0x18c   : > { %1159 = vmatpush1.msra.mxu0 %v494_v13  ;;  %1248 = vmatpush1.msra.mxu1 %v496_v14 }
 0x18d   : > { %1160 = vmatprep.subr.mxu0 %v487_v15  ;;  %1249 = vmatprep.subr.mxu1 %v489_v16 }
 0x18e   : > { %1161 = vmatpush1.msra.mxu0 %v486_v17  ;;  %1250 = vmatpush1.msra.mxu1 %v488_v18 }
 0x18f   : > { %1162 = vmatprep.subr.mxu0 %v479_v19  ;;  %1251 = vmatprep.subr.mxu1 %v481_v20 }
 0x190   : > { %1163 = vmatpush1.msra.mxu0 %v478_v21  ;;  %1252 = vmatpush1.msra.mxu1 %v480_v24 }
 0x191   : > { %1164 = vmatprep.subr.mxu0 %v471_v25  ;;  %1253 = vmatprep.subr.mxu1 %v473_v26 }
 0x192   : > { %1165 = vmatpush1.msra.mxu0 %v470_v27  ;;  %1254 = vmatpush1.msra.mxu1 %v472_v28 }
 0x193   : > { %1166 = vmatprep.subr.mxu0 %v463_v29  ;;  %1255 = vmatprep.subr.mxu1 %v465_v30 }
 0x194   : > { %1167 = vmatpush1.msra.mxu0 %v462_v1  ;;  %1256 = vmatpush1.msra.mxu1 %v464_v32 }
 0x195   : > { %1168 = vmatprep.subr.mxu0 %v455_v23  ;;  %1257 = vmatprep.subr.mxu1 %v457_v34 }
 0x196   : > { %1169 = vmatpush1.msra.mxu0 %v454_v35  ;;  %1258 = vmatpush1.msra.mxu1 %v456_v36 }
 0x197   : > { %1170 = vmatprep.subr.mxu0 %v447_v37  ;;  %1259 = vmatprep.subr.mxu1 %v449_v38 }
 0x198   : > { %1171 = vmatpush1.msra.mxu0 %v446_v39  ;;  %1260 = vmatpush1.msra.mxu1 %v448_v40 }
 0x199   : > { %1172 = vmatprep.subr.mxu0 %v439_v0  ;;  %1261 = vmatprep.subr.mxu1 %v441_v41 }
 0x19a   : > { %1173 = vmatpush1.msra.mxu0 %v438_v42  ;;  %1206 = vmatprep.mubr.f32.mxu0 %v1871_v22 }
 0x19b   : > { %1262 = vmatpush1.msra.mxu1 %v440_v43  ;;  %1295 = vmatprep.mubr.f32.mxu1 %v1871_v22 }
 0x19c   : > { %1207 = vmatmul.mubr.f32.vlgmr.msra.gmra.mxu0 %v2081_v33  ;;  %1296 = vmatmul.mubr.f32.vlgmr.msra.gmra.mxu1 %v2081_v33 }
 0x19d   : > { %1212 = vmatprep.mubr.f32.mxu0 %v1871_v22  ;;  %1301 = vmatprep.mubr.f32.mxu1 %v1871_v22 }
 0x1a0   : > { %1213 = vmatmul.mubr.f32.gmra.mxu0 %v2089_v45  ;;  %1302 = vmatmul.mubr.f32.gmra.mxu1 %v2089_v45 }
 0x1a1   : > { %1218 = vmatprep.mubr.f32.mxu0 %v1871_v22  ;;  %1307 = vmatprep.mubr.f32.mxu1 %v1871_v22 }
 0x1a4   : > { %1219 = vmatmul.mubr.f32.gmra.mxu0 %v2097_v56  ;;  %1308 = vmatmul.mubr.f32.gmra.mxu1 %v2097_v56 }
 0x1a5   : > { %1224 = vmatprep.mubr.f32.mxu0 %v1871_v22  ;;  %1313 = vmatprep.mubr.f32.mxu1 %v1871_v22 }
 0x1a8   : > { %1225 = vmatmul.mubr.f32.gmra.mxu0 %v2101_v4  ;;  %1314 = vmatmul.mubr.f32.gmra.mxu1 %v2101_v4 }
 0x235   : > { %v1030_v33 = vpop.f32.mrf.mxu0  ;;  %v1119_v44 = vpop.f32.mrf.mxu1 }
 0x236   : > { %1320 = vst [vmem:[%s2124_s7] sm:$0xff] %v1030_v33  ;;  %1322 = vst [vmem:[%s2124_s7 + $0x10] sm:$0xff] %v1119_v44 }
 0x237   : > { %v1032_v22 = vpop.f32.mrf.mxu0  ;;  %v1121_v45 = vpop.f32.mrf.mxu1 }
 0x238   : > { %1321 = vst [vmem:[%s2124_s7 + $0x8] sm:$0xff] %v1032_v22  ;;  %1323 = vst [vmem:[%s2124_s7 + $0x18] sm:$0xff] %v1121_v45 }
 0x23b   : > { %v1036_v46 = vpop.f32.mrf.mxu0  ;;  %v1125_v47 = vpop.f32.mrf.mxu1 }
 0x23c   : > { %1328 = vst [vmem:[%s2124_s7 + $0x40] sm:$0xff] %v1036_v46  ;;  %1330 = vst [vmem:[%s2124_s7 + $0x50] sm:$0xff] %v1125_v47 }
 0x23d   : > { %v1038_v48 = vpop.f32.mrf.mxu0  ;;  %v1127_v49 = vpop.f32.mrf.mxu1 }
 0x23e   : > { %1329 = vst [vmem:[%s2124_s7 + $0x48] sm:$0xff] %v1038_v48  ;;  %1331 = vst [vmem:[%s2124_s7 + $0x58] sm:$0xff] %v1127_v49 }
 0x241   : > { %v1042_v50 = vpop.f32.mrf.mxu0  ;;  %v1131_v31 = vpop.f32.mrf.mxu1 }
 0x242   : > { %1336 = vst [vmem:[%s2124_s7 + $0x80] sm:$0xff] %v1042_v50  ;;  %1338 = vst [vmem:[%s2124_s7 + $0x90] sm:$0xff] %v1131_v31 }
 0x243   : > { %v1044_v51 = vpop.f32.mrf.mxu0  ;;  %v1133_v52 = vpop.f32.mrf.mxu1 }
 0x244   : > { %1337 = vst [vmem:[%s2124_s7 + $0x88] sm:$0xff] %v1044_v51  ;;  %1339 = vst [vmem:[%s2124_s7 + $0x98] sm:$0xff] %v1133_v52 }
 0x247   : > { %v1048_v53 = vpop.f32.mrf.mxu0  ;;  %v1137_v54 = vpop.f32.mrf.mxu1 }
 0x248   : > { %1344 = vst [vmem:[%s2124_s7 + $0xc0] sm:$0xff] %v1048_v53  ;;  %1346 = vst [vmem:[%s2124_s7 + $0xd0] sm:$0xff] %v1137_v54 }
 0x249   : > { %v1050_v55 = vpop.f32.mrf.mxu0  ;;  %v1139_v56 = vpop.f32.mrf.mxu1 }
 0x24a   : > { %1345 = vst [vmem:[%s2124_s7 + $0xc8] sm:$0xff] %v1050_v55  ;;  %1347 = vst [vmem:[%s2124_s7 + $0xd8] sm:$0xff] %v1139_v56 }
 0x25c   : > { %v1208_v57 = vpop.f32.mrf.mxu0  ;;  %v1297_v58 = vpop.f32.mrf.mxu1 }
 0x25d   : > { %1324 = vst [vmem:[%s2124_s7 + $0x20] sm:$0xff] %v1208_v57  ;;  %1326 = vst [vmem:[%s2124_s7 + $0x30] sm:$0xff] %v1297_v58 }
 0x25e   : > { %v1210_v59 = vpop.f32.mrf.mxu0  ;;  %v1299_v60 = vpop.f32.mrf.mxu1 }
 0x25f   : > { %1325 = vst [vmem:[%s2124_s7 + $0x28] sm:$0xff] %v1210_v59  ;;  %1327 = vst [vmem:[%s2124_s7 + $0x38] sm:$0xff] %v1299_v60 }
 0x260   : > { %v1214_v61 = vpop.f32.mrf.mxu0  ;;  %v1303_v62 = vpop.f32.mrf.mxu1 }
 0x261   : > { %1332 = vst [vmem:[%s2124_s7 + $0x60] sm:$0xff] %v1214_v61  ;;  %1334 = vst [vmem:[%s2124_s7 + $0x70] sm:$0xff] %v1303_v62 }
 0x262   : > { %v1216_v63 = vpop.f32.mrf.mxu0  ;;  %v1305_v2 = vpop.f32.mrf.mxu1 }
 0x263   : > { %1333 = vst [vmem:[%s2124_s7 + $0x68] sm:$0xff] %v1216_v63  ;;  %1335 = vst [vmem:[%s2124_s7 + $0x78] sm:$0xff] %v1305_v2 }
 0x264   : > { %v1220_v3 = vpop.f32.mrf.mxu0  ;;  %v1309_v4 = vpop.f32.mrf.mxu1 }
 0x265   : > { %1340 = vst [vmem:[%s2124_s7 + $0xa0] sm:$0xff] %v1220_v3  ;;  %1342 = vst [vmem:[%s2124_s7 + $0xb0] sm:$0xff] %v1309_v4 }
 0x266   : > { %v1222_v5 = vpop.f32.mrf.mxu0  ;;  %v1311_v6 = vpop.f32.mrf.mxu1 }
 0x267   : > { %1341 = vst [vmem:[%s2124_s7 + $0xa8] sm:$0xff] %v1222_v5  ;;  %1343 = vst [vmem:[%s2124_s7 + $0xb8] sm:$0xff] %v1311_v6 }
 0x268   : > { %v1226_v7 = vpop.f32.mrf.mxu0  ;;  %v1315_v8 = vpop.f32.mrf.mxu1 }
 0x269   : > { %1348 = vst [vmem:[%s2124_s7 + $0xe0] sm:$0xff] %v1226_v7  ;;  %1350 = vst [vmem:[%s2124_s7 + $0xf0] sm:$0xff] %v1315_v8 }
 0x26a   : > { %v1228_v9 = vpop.f32.mrf.mxu0  ;;  %v1317_v10 = vpop.f32.mrf.mxu1 }
 0x26b   : > { %1349 = vst [vmem:[%s2124_s7 + $0xe8] sm:$0xff] %v1228_v9  ;;  %1351 = vst [vmem:[%s2124_s7 + $0xf8] sm:$0xff] %v1317_v10 }
 0x26c   : > { %1803 = shalt.err (!%p1800_p9)
}
 0x26d   : > { %s1804_s12 = scalar_lea.hbm %s2159_s15, 4096  ;;  %s1808_s16 = scalar_lea.hbm %s2214_s6, 8192 }
 0x26e   : > { %p1805_p13 = scmp.ne.s32.totalorder %s2159_s15, %s1804_s12  ;;  %p1809_p0 = scmp.lt.s32.totalorder %s2159_s15, %s2214_s6 }
 0x26f   : > { %p1810_p4 = scmp.lt.s32.totalorder %s1808_s16, %s1804_s12 }
 0x270   : > { %p1806_p5 = pnand %p1805_p13, %p2232_p11 }
 0x271   : > { %p1811_p8 = por %p1810_p4, %p1809_p0 }
 0x272   : > { %p1807_p10 = pneg %p1806_p5 }
 0x274   : > { %p1812_p7 = pnand %p1811_p8, %p1807_p10 }
 0x276   : > { %1815 = shalt.err (!%p1812_p7)
}
 0x277   : > { %s1873_s10 = smov 1024   ;;  %s1874_s27 = smov 64  }
 0x278   : > { %1631 = dma.vmem_to_hbm [thread:$0]  (%p2232_p11), %s2161_s1, 4096, %s2159_s15, %s1353_s25, %s1873_s10, %s1873_s10, %s1874_s27  }
 0x279 PF: > { %s1382_s29 = sand.u32 1, %s1846_s21   ;;  %p2233_p1 = scmp.ne.s32.totalorder %s2221_s28, 0 }
 0x27a   : > { %p2234_p2 = scmp.ge.s32.totalorder %s1858_s24, 2  ;;  %s1383_s17 = scalar_lea.sflag [#allocation4], %s1382_s29 }
 0x27c   : > { %p1645_p6 = pnand %p2234_p2, %p2233_p1 }
 0x27e   : > { %p1646_p12 = pneg %p1645_p6 }
 0x280   : > { %1841 = dma.done.wait (%p1646_p12), %s1383_s17, 4096  }
 0x281   : > { %1843 = vsyncadd (%p1646_p12), %s1383_s17, 4294963200  ;;  %p20_p3 = scmp.ge.s32.totalorder %s1982_s26, 4   ;;  %s2235_s21 = smov %s1850_s22 }
 0x282   : > { %s2236_s22 = smov %s1854_s23  ;;  %s2237_s23 = smov %s1991_s9 }
 0x283   : > { %s2238_s24 = smov %s1982_s26  ;;  %22 = sbr.rel (!%p20_p3) target bundleno = 8 (0x8), region = 97 }
 0x288   :  { %1388 = vsyncpa [#allocation3], 1 }
 0x289   :  { %1390 = vsyncpa [#allocation3 + $0x1], 1 }
 0x28a   :  { %1391 = vsyncpa [#allocation6], 1 }
 0x28b   :  { %1392 = vsyncpa [#allocation4], 1 }
 0x28c   :  { %1394 = vsyncpa [#allocation4 + $0x1], 1 }

</bundles_post_ra>
